<compile_context>
chip_gen: v5e
topology: v5e:2x2
jax: 0.10.0
libtpu: 0.0.40
codegen_flags: <defaults>
</compile_context>

<pallas_src>
import functools

import jax
import jax.numpy as jnp
from jax.experimental import pallas as pl
from jax.experimental.pallas import tpu as pltpu


def _pair(v):
    if isinstance(v, (tuple, list)):
        return tuple(int(x) for x in v)
    return (int(v), int(v))


def _round_up(v, m):
    return ((v + m - 1) // m) * m


def _pick_tile_oh(OH, OW, max_tile_m):
    """Largest output-row tile that (a) divides OH, (b) is a multiple of 8
    (BlockSpec second-minor rule) and (c) keeps TILE_OH*OW <= max_tile_m.
    Falls back to the whole image if no such divisor exists."""
    if OH * OW <= max_tile_m:
        return OH
    divs = [d for d in range(8, OH + 1, 8) if OH % d == 0]
    if not divs:
        return OH
    fitting = [d for d in divs if d * OW <= max_tile_m]
    return max(fitting) if fitting else min(divs)


def _vreg_padded_bytes(shape, dtype):
    """Conservative VMEM footprint of a buffer (lane/sublane padded)."""
    dt = jnp.dtype(dtype)
    dims = list(shape) if len(shape) else [1]
    dims[-1] = _round_up(dims[-1], 128)
    if len(dims) >= 2:
        dims[-2] = _round_up(dims[-2], max(8, 32 // dt.itemsize))
    n = 1
    for d in dims:
        n *= int(d)
    return n * dt.itemsize


def _pick_vmem_limit(need_bytes):
    """Derive vmem_limit_bytes from actual buffer sizes + chip capacity
    (review: never hard-code 64 MiB, which is all of v7x's per-TC VMEM)."""
    try:
        info = pltpu.get_tpu_info()
        cap = int(getattr(info, "vmem_capacity_bytes", 64 * 1024 * 1024))
    except Exception:  # pragma: no cover - conservative fallback (v7x-sized)
        cap = 64 * 1024 * 1024
    limit = int(need_bytes * 1.25) + (4 << 20)
    limit = max(limit, 16 << 20)
    limit = min(limit, (cap * 3) // 4)
    limit = max(limit, min(int(need_bytes) + (2 << 20), cap))
    return int(limit)


def _conv2d_kernel(x_ref, w_ref, b_ref, o_ref, *scratch,
                   H, W, OH, OW, KH, KW, SH, SW, DH, DW, PH, PW,
                   TILE_OH, K, Kp):
    # x_ref : (cin_g, H, W)        one batch, one group, channel-major (NCHW)
    # w_ref : (cout_g, Kp)         K order = (kh, kw, cin), zero-padded to Kp
    # b_ref : (cout_g, 1)          f32 bias
    # o_ref : (cout_g, TILE_OH, OW) output tile (NCHW)
    # scratch (in order, only if needed):
    #   col_ref  : (Kp, TILE_M)    transposed im2col matrix   (iff KH*KW > 1)
    #   xpad_ref : (cin_g, Hp, Wp) zero-halo padded image     (iff PH|PW > 0)
    C = x_ref.shape[0]
    TILE_M = TILE_OH * OW
    use_col = (KH * KW) > 1
    has_pad = (PH > 0) or (PW > 0)
    Hp, Wp = H + 2 * PH, W + 2 * PW

    idx = 0
    col_ref = None
    if use_col:
        col_ref = scratch[idx]
        idx += 1
    xpad_ref = None
    if has_pad:
        xpad_ref = scratch[idx]
        idx += 1

    mt = pl.program_id(2)

    # Once per (g, n) image: build the zero-halo padded copy and zero the
    # K-padding rows of the col matrix.  Scratch persists across the MT axis.
    @pl.when(mt == 0)
    def _setup():
        if has_pad:
            if PH > 0:
                xpad_ref[:, 0:PH, :] = jnp.zeros((C, PH, Wp), xpad_ref.dtype)
                xpad_ref[:, PH + H:Hp, :] = jnp.zeros((C, PH, Wp),
                                                      xpad_ref.dtype)
            if PW > 0:
                # Note(v5e): these W-side strips are lane-narrow masked stores;
                # they run once per image, not per tile.
                xpad_ref[:, :, 0:PW] = jnp.zeros((C, Hp, PW), xpad_ref.dtype)
                xpad_ref[:, :, PW + W:Wp] = jnp.zeros((C, Hp, PW),
                                                      xpad_ref.dtype)
            xpad_ref[:, PH:PH + H, PW:PW + W] = x_ref[...]
        if use_col and Kp > K:
            col_ref[K:Kp, :] = jnp.zeros((Kp - K, TILE_M), col_ref.dtype)

    row_base = pl.multiple_of(mt * (TILE_OH * SH), TILE_OH * SH)

    def load_tap(kh, kw):
        src = xpad_ref if has_pad else x_ref
        r0 = row_base + kh * DH
        c0 = kw * DW
        if SH == 1 and SW == 1:
            v = src[:, pl.ds(r0, TILE_OH), c0:c0 + OW]
        else:
            rs = (TILE_OH - 1) * SH + 1
            cs = (OW - 1) * SW + 1
            v = src[:, pl.ds(r0, rs), c0:c0 + cs]
            v = v[:, ::SH, ::SW]
        return v.reshape(C, TILE_M)

    if use_col:
        # Transposed im2col: each tap store is (C sublanes, TILE_M lanes) =>
        # lane-dense stores; each element written once, read once by the MXU.
        for kh in range(KH):
            for kw in range(KW):
                t = kh * KW + kw
                col_ref[t * C:(t + 1) * C, :] = (
                    load_tap(kh, kw).astype(col_ref.dtype))
        rhs = col_ref[...]                        # (Kp, TILE_M)
    else:
        rhs = load_tap(0, 0).astype(w_ref.dtype)  # 1x1 conv: no col scratch

    acc = jnp.dot(w_ref[...], rhs, preferred_element_type=jnp.float32)
    acc = acc + b_ref[...]                        # (cout_g, 1) broadcast
    o_ref[...] = acc.reshape(acc.shape[0], TILE_OH, OW).astype(o_ref.dtype)


def conv2d_custom(x, weight, bias=None, stride=1, padding=0, dilation=1,
                  groups=1, compute_dtype=None, max_tile_m=2048):
    """Forward pass of Conv2d_custom (== F.conv2d), NCHW in / NCHW out."""
    stride, padding, dilation = _pair(stride), _pair(padding), _pair(dilation)
    N, Cin, H, W = x.shape
    Cout, cin_g, KH, KW = weight.shape
    G = int(groups)
    assert Cin % G == 0 and Cout % G == 0 and cin_g == Cin // G
    cout_g = Cout // G
    SH, SW = stride
    PH, PW = padding
    DH, DW = dilation

    OH = (H + 2 * PH - DH * (KH - 1) - 1) // SH + 1
    OW = (W + 2 * PW - DW * (KW - 1) - 1) // SW + 1
    assert OH > 0 and OW > 0
    Hp, Wp = H + 2 * PH, W + 2 * PW
    T = KH * KW
    K = T * cin_g
    use_col = T > 1
    Kp = _round_up(K, 128) if use_col else K
    has_pad = (PH > 0) or (PW > 0)

    cdt = jnp.dtype(x.dtype if compute_dtype is None else compute_dtype)

    TILE_OH = _pick_tile_oh(OH, OW, max_tile_m)
    MT = OH // TILE_OH
    TILE_M = TILE_OH * OW

    if bias is None:
        bias = jnp.zeros((Cout,), jnp.float32)

    # NCHW -> (N, G, cin_g, H, W): a pure reshape, no layout transform at all.
    xg = x.reshape(N, G, cin_g, H, W)

    # weight (G*cout_g, cin_g, KH, KW) -> (G, cout_g, Kp); K order (kh, kw, c)
    # matches the im2col row order; K zero-padded to Kp.
    w = weight.reshape(G, cout_g, cin_g, KH, KW)
    w = jnp.transpose(w, (0, 1, 3, 4, 2)).reshape(G, cout_g, K)
    if Kp != K:
        w = jnp.pad(w, ((0, 0), (0, 0), (0, Kp - K)))
    w = w.astype(cdt)

    b = bias.reshape(G, cout_g, 1).astype(jnp.float32)

    scratch_shapes = []
    if use_col:
        scratch_shapes.append(pltpu.VMEM((Kp, TILE_M), cdt))
    if has_pad:
        scratch_shapes.append(pltpu.VMEM((cin_g, Hp, Wp), x.dtype))

    # Derive a VMEM budget from the actual working set (double-buffered
    # BlockSpec operands + scratch) instead of hard-coding 64 MiB.
    need = 0
    need += 2 * _vreg_padded_bytes((cin_g, H, W), x.dtype)
    need += 2 * _vreg_padded_bytes((cout_g, Kp), cdt)
    need += 2 * _vreg_padded_bytes((cout_g, 1), jnp.float32)
    need += 2 * _vreg_padded_bytes((cout_g, TILE_OH, OW), x.dtype)
    if use_col:
        need += _vreg_padded_bytes((Kp, TILE_M), cdt)
    if has_pad:
        need += _vreg_padded_bytes((cin_g, Hp, Wp), x.dtype)
    vmem_limit = _pick_vmem_limit(need)

    kernel = functools.partial(
        _conv2d_kernel, H=H, W=W, OH=OH, OW=OW, KH=KH, KW=KW,
        SH=SH, SW=SW, DH=DH, DW=DW, PH=PH, PW=PW,
        TILE_OH=TILE_OH, K=K, Kp=Kp)

    out = pl.pallas_call(
        kernel,
        out_shape=jax.ShapeDtypeStruct((N, G, cout_g, OH, OW), x.dtype),
        grid_spec=pltpu.PrefetchScalarGridSpec(
            num_scalar_prefetch=0,
            # G outermost, N next, output-row tiles innermost: weight/bias
            # blocks stay resident across the whole inner (N, MT) loop and the
            # x block stays resident across the MT loop.
            grid=(G, N, MT),
            in_specs=[
                pl.BlockSpec((None, None, cin_g, H, W),
                             lambda g, n, mt: (n, g, 0, 0, 0)),
                pl.BlockSpec((None, cout_g, Kp),
                             lambda g, n, mt: (g, 0, 0)),
                pl.BlockSpec((None, cout_g, 1),
                             lambda g, n, mt: (g, 0, 0)),
            ],
            out_specs=pl.BlockSpec((None, None, cout_g, TILE_OH, OW),
                                   lambda g, n, mt: (n, g, 0, mt, 0)),
            scratch_shapes=scratch_shapes,
        ),
        compiler_params=pltpu.CompilerParams(
            dimension_semantics=("parallel", "parallel", "arbitrary"),
            vmem_limit_bytes=vmem_limit,
        ),
    )(xg, w, b)

    # (N, G, cout_g, OH, OW) is already NCHW with group-major channels:
    # the only post-processing is a free reshape.
    return out.reshape(N, Cout, OH, OW)


def _reference_conv2d(x, w, b, stride, padding, dilation, groups):
    out = jax.lax.conv_general_dilated(
        x, w,
        window_strides=_pair(stride),
        padding=[(p, p) for p in _pair(padding)],
        rhs_dilation=_pair(dilation),
        dimension_numbers=("NCHW", "OIHW", "NCHW"),
        feature_group_count=groups,
        precision=jax.lax.Precision.HIGHEST,
    )
    return out + b[None, :, None, None]


def _run_case(name, N, Cin, H, W, Cout, KH, KW, stride, padding, dilation,
              groups, use_bias, key, compute_dtype=None, max_tile_m=2048,
              atol=2e-3, rtol=2e-3):
    kx, kw_, kb = jax.random.split(key, 3)
    x = jax.random.normal(kx, (N, Cin, H, W), dtype=jnp.float32)
    weight = jax.random.normal(kw_, (Cout, Cin // groups, KH, KW),
                               dtype=jnp.float32) * 0.1
    bias = (jax.random.normal(kb, (Cout,), dtype=jnp.float32) * 0.1
            if use_bias else None)

    out = conv2d_custom(x, weight, bias, stride, padding, dilation, groups,
                        compute_dtype=compute_dtype, max_tile_m=max_tile_m)
    out = jax.block_until_ready(out)

    b_arr = bias if bias is not None else jnp.zeros((Cout,), jnp.float32)
    ref = _reference_conv2d(x, weight, b_arr, stride, padding, dilation,
                            groups)
    assert out.shape == ref.shape, (name, out.shape, ref.shape)
    assert jnp.allclose(out, ref, atol=atol, rtol=rtol), f"mismatch in {name}"


if __name__ == "__main__":
    key = jax.random.PRNGKey(0)
    k1, k2, k3, k4, k5, k6 = jax.random.split(key, 6)

    # Primary config (module defaults used in the ONNX test):
    # batch=2, Cin=4, 16x16 spatial, Cout=8, 3x3 kernel, stride=1, pad=1, bias.
    _run_case("conv3x3_pad1", 2, 4, 16, 16, 8, 3, 3,
              stride=1, padding=1, dilation=1, groups=1, use_bias=True, key=k1)

    # Same config with a reduced tile budget to exercise the output-row tile
    # axis (MT = 2: padded-image / col-pad scratch reuse across tiles).
    _run_case("conv3x3_pad1_tiled", 2, 4, 16, 16, 8, 3, 3,
              stride=1, padding=1, dilation=1, groups=1, use_bias=True, key=k2,
              max_tile_m=128)

    # 1x1 conv, no padding, no bias (no-col / no-halo path).
    _run_case("conv1x1", 1, 8, 8, 8, 16, 1, 1,
              stride=1, padding=0, dilation=1, groups=1, use_bias=False,
              key=k3)

    # Grouped conv (narrow per-group channels handled in one pallas_call).
    _run_case("conv3x3_groups2", 2, 4, 8, 8, 8, 3, 3,
              stride=1, padding=1, dilation=1, groups=2, use_bias=True, key=k4)

    # Dilated conv.
    _run_case("conv3x3_dil2", 1, 4, 16, 16, 8, 3, 3,
              stride=1, padding=2, dilation=2, groups=1, use_bias=True, key=k5)

    # bf16 MXU inputs (f32 accumulate); looser tolerance for the bf16 cast.
    _run_case("conv3x3_pad1_bf16", 2, 4, 16, 16, 8, 3, 3,
              stride=1, padding=1, dilation=1, groups=1, use_bias=True, key=k6,
              compute_dtype=jnp.bfloat16, atol=3e-2, rtol=3e-2)

    print("KERNEL_OK")
</pallas_src>

<mosaic_0001>
module attributes {stable_mosaic.version = 11 : i64} {
  func.func @_conv2d_kernel(%arg0: i32, %arg1: i32, %arg2: i32, %arg3: memref<1x1x4x16x16xf32, #tpu.memory_space<vmem>>, %arg4: memref<1x8x128xf32, #tpu.memory_space<vmem>>, %arg5: memref<1x8x1xf32, #tpu.memory_space<vmem>>, %arg6: memref<1x1x8x16x16xf32, #tpu.memory_space<vmem>>, %arg7: memref<128x256xf32, #tpu.memory_space<vmem>>, %arg8: memref<4x18x18xf32, #tpu.memory_space<vmem>>) attributes {dimension_semantics = [#tpu.dimension_semantics<parallel>, #tpu.dimension_semantics<parallel>, #tpu.dimension_semantics<arbitrary>], iteration_bounds = array<i64: 1, 2, 1>, scalar_prefetch = 0 : i64, scratch_operands = 2 : i64, tpu.core_type = #tpu.core_type<tc>, window_params = [{transform_indices = @transform_0, window_bounds = array<i64: 1, 1, 4, 16, 16>}, {transform_indices = @transform_1, window_bounds = array<i64: 1, 8, 128>}, {transform_indices = @transform_2, window_bounds = array<i64: 1, 8, 1>}, {transform_indices = @transform_3, window_bounds = array<i64: 1, 1, 8, 16, 16>}]} {
    %c0_i32 = arith.constant 0 : i32
    %0 = arith.cmpi eq, %arg2, %c0_i32 : i32
    %1 = arith.extui %0 : i1 to i32
    %c0_i32_0 = arith.constant 0 : i32
    %2 = arith.cmpi ne, %1, %c0_i32_0 : i32
    scf.if %2 {
      %cst_46 = arith.constant 0.000000e+00 : f32
      %62 = vector.broadcast %cst_46 : f32 to vector<4x1x18xf32>
      %c0_47 = arith.constant 0 : index
      %c0_48 = arith.constant 0 : index
      %c0_49 = arith.constant 0 : index
      %63 = vector.load %arg8[%c0_47, %c0_48, %c0_49] : memref<4x18x18xf32, #tpu.memory_space<vmem>>, vector<4x1x18xf32>
      tpu.vector_store %arg8[%c0_47, %c0_48, %c0_49], %62 {strides = array<i32>} : memref<4x18x18xf32, #tpu.memory_space<vmem>>, vector<4x1x18xf32>,
      %cst_50 = arith.constant 0.000000e+00 : f32
      %64 = vector.broadcast %cst_50 : f32 to vector<4x1x18xf32>
      %c0_51 = arith.constant 0 : index
      %c17 = arith.constant 17 : index
      %c0_52 = arith.constant 0 : index
      %65 = vector.load %arg8[%c0_51, %c17, %c0_52] : memref<4x18x18xf32, #tpu.memory_space<vmem>>, vector<4x1x18xf32>
      tpu.vector_store %arg8[%c0_51, %c17, %c0_52], %64 {strides = array<i32>} : memref<4x18x18xf32, #tpu.memory_space<vmem>>, vector<4x1x18xf32>,
      %cst_53 = arith.constant 0.000000e+00 : f32
      %66 = vector.broadcast %cst_53 : f32 to vector<4x18x1xf32>
      %c0_54 = arith.constant 0 : index
      %c0_55 = arith.constant 0 : index
      %c0_56 = arith.constant 0 : index
      %67 = vector.load %arg8[%c0_54, %c0_55, %c0_56] : memref<4x18x18xf32, #tpu.memory_space<vmem>>, vector<4x18x1xf32>
      tpu.vector_store %arg8[%c0_54, %c0_55, %c0_56], %66 {strides = array<i32>} : memref<4x18x18xf32, #tpu.memory_space<vmem>>, vector<4x18x1xf32>,
      %cst_57 = arith.constant 0.000000e+00 : f32
      %68 = vector.broadcast %cst_57 : f32 to vector<4x18x1xf32>
      %c0_58 = arith.constant 0 : index
      %c0_59 = arith.constant 0 : index
      %c17_60 = arith.constant 17 : index
      %69 = vector.load %arg8[%c0_58, %c0_59, %c17_60] : memref<4x18x18xf32, #tpu.memory_space<vmem>>, vector<4x18x1xf32>
      tpu.vector_store %arg8[%c0_58, %c0_59, %c17_60], %68 {strides = array<i32>} : memref<4x18x18xf32, #tpu.memory_space<vmem>>, vector<4x18x1xf32>,
      %c0_61 = arith.constant 0 : index
      %c0_62 = arith.constant 0 : index
      %c0_63 = arith.constant 0 : index
      %c0_64 = arith.constant 0 : index
      %c0_65 = arith.constant 0 : index
      %70 = vector.load %arg3[%c0_61, %c0_62, %c0_63, %c0_64, %c0_65] : memref<1x1x4x16x16xf32, #tpu.memory_space<vmem>>, vector<1x1x4x16x16xf32>
      %71 = vector.shape_cast %70 : vector<1x1x4x16x16xf32> to vector<4x16x16xf32>
      %c0_66 = arith.constant 0 : index
      %c1_67 = arith.constant 1 : index
      %c1_68 = arith.constant 1 : index
      %72 = vector.load %arg8[%c0_66, %c1_67, %c1_68] : memref<4x18x18xf32, #tpu.memory_space<vmem>>, vector<4x16x16xf32>
      tpu.vector_store %arg8[%c0_66, %c1_67, %c1_68], %71 {strides = array<i32>} : memref<4x18x18xf32, #tpu.memory_space<vmem>>, vector<4x16x16xf32>,
      %cst_69 = arith.constant 0.000000e+00 : f32
      %73 = vector.broadcast %cst_69 : f32 to vector<92x256xf32>
      %c36 = arith.constant 36 : index
      %c0_70 = arith.constant 0 : index
      %74 = vector.load %arg7[%c36, %c0_70] : memref<128x256xf32, #tpu.memory_space<vmem>>, vector<92x256xf32>
      tpu.vector_store %arg7[%c36, %c0_70], %73 {strides = array<i32>} : memref<128x256xf32, #tpu.memory_space<vmem>>, vector<92x256xf32>,
    } else {
    }
    %c16_i32 = arith.constant 16 : i32
    %3 = arith.muli %arg2, %c16_i32 : i32
    %4 = tpu.assume_multiple %3, 16 : i32
    %c0_i32_1 = arith.constant 0 : i32
    %5 = arith.addi %4, %c0_i32_1 : i32
    %c0 = arith.constant 0 : index
    %6 = arith.index_cast %5 : i32 to index
    %c0_2 = arith.constant 0 : index
    %7 = vector.load %arg8[%c0, %6, %c0_2] : memref<4x18x18xf32, #tpu.memory_space<vmem>>, vector<4x16x16xf32>
    %8 = vector.shape_cast %7 : vector<4x16x16xf32> to vector<4x256xf32>
    %c0_3 = arith.constant 0 : index
    %c0_4 = arith.constant 0 : index
    %9 = vector.load %arg7[%c0_3, %c0_4] : memref<128x256xf32, #tpu.memory_space<vmem>>, vector<4x256xf32>
    tpu.vector_store %arg7[%c0_3, %c0_4], %8 {strides = array<i32>} : memref<128x256xf32, #tpu.memory_space<vmem>>, vector<4x256xf32>,
    %c0_i32_5 = arith.constant 0 : i32
    %10 = arith.addi %4, %c0_i32_5 : i32
    %c0_6 = arith.constant 0 : index
    %11 = arith.index_cast %10 : i32 to index
    %c1 = arith.constant 1 : index
    %12 = vector.load %arg8[%c0_6, %11, %c1] : memref<4x18x18xf32, #tpu.memory_space<vmem>>, vector<4x16x16xf32>
    %13 = vector.shape_cast %12 : vector<4x16x16xf32> to vector<4x256xf32>
    %c4 = arith.constant 4 : index
    %c0_7 = arith.constant 0 : index
    %14 = vector.load %arg7[%c4, %c0_7] : memref<128x256xf32, #tpu.memory_space<vmem>>, vector<4x256xf32>
    tpu.vector_store %arg7[%c4, %c0_7], %13 {strides = array<i32>} : memref<128x256xf32, #tpu.memory_space<vmem>>, vector<4x256xf32>,
    %c0_i32_8 = arith.constant 0 : i32
    %15 = arith.addi %4, %c0_i32_8 : i32
    %c0_9 = arith.constant 0 : index
    %16 = arith.index_cast %15 : i32 to index
    %c2 = arith.constant 2 : index
    %17 = vector.load %arg8[%c0_9, %16, %c2] : memref<4x18x18xf32, #tpu.memory_space<vmem>>, vector<4x16x16xf32>
    %18 = vector.shape_cast %17 : vector<4x16x16xf32> to vector<4x256xf32>
    %c8 = arith.constant 8 : index
    %c0_10 = arith.constant 0 : index
    %19 = vector.load %arg7[%c8, %c0_10] : memref<128x256xf32, #tpu.memory_space<vmem>>, vector<4x256xf32>
    tpu.vector_store %arg7[%c8, %c0_10], %18 {strides = array<i32>} : memref<128x256xf32, #tpu.memory_space<vmem>>, vector<4x256xf32>,
    %c1_i32 = arith.constant 1 : i32
    %20 = arith.addi %4, %c1_i32 : i32
    %c0_11 = arith.constant 0 : index
    %21 = arith.index_cast %20 : i32 to index
    %c0_12 = arith.constant 0 : index
    %22 = vector.load %arg8[%c0_11, %21, %c0_12] : memref<4x18x18xf32, #tpu.memory_space<vmem>>, vector<4x16x16xf32>
    %23 = vector.shape_cast %22 : vector<4x16x16xf32> to vector<4x256xf32>
    %c12 = arith.constant 12 : index
    %c0_13 = arith.constant 0 : index
    %24 = vector.load %arg7[%c12, %c0_13] : memref<128x256xf32, #tpu.memory_space<vmem>>, vector<4x256xf32>
    tpu.vector_store %arg7[%c12, %c0_13], %23 {strides = array<i32>} : memref<128x256xf32, #tpu.memory_space<vmem>>, vector<4x256xf32>,
    %c1_i32_14 = arith.constant 1 : i32
    %25 = arith.addi %4, %c1_i32_14 : i32
    %c0_15 = arith.constant 0 : index
    %26 = arith.index_cast %25 : i32 to index
    %c1_16 = arith.constant 1 : index
    %27 = vector.load %arg8[%c0_15, %26, %c1_16] : memref<4x18x18xf32, #tpu.memory_space<vmem>>, vector<4x16x16xf32>
    %28 = vector.shape_cast %27 : vector<4x16x16xf32> to vector<4x256xf32>
    %c16 = arith.constant 16 : index
    %c0_17 = arith.constant 0 : index
    %29 = vector.load %arg7[%c16, %c0_17] : memref<128x256xf32, #tpu.memory_space<vmem>>, vector<4x256xf32>
    tpu.vector_store %arg7[%c16, %c0_17], %28 {strides = array<i32>} : memref<128x256xf32, #tpu.memory_space<vmem>>, vector<4x256xf32>,
    %c1_i32_18 = arith.constant 1 : i32
    %30 = arith.addi %4, %c1_i32_18 : i32
    %c0_19 = arith.constant 0 : index
    %31 = arith.index_cast %30 : i32 to index
    %c2_20 = arith.constant 2 : index
    %32 = vector.load %arg8[%c0_19, %31, %c2_20] : memref<4x18x18xf32, #tpu.memory_space<vmem>>, vector<4x16x16xf32>
    %33 = vector.shape_cast %32 : vector<4x16x16xf32> to vector<4x256xf32>
    %c20 = arith.constant 20 : index
    %c0_21 = arith.constant 0 : index
    %34 = vector.load %arg7[%c20, %c0_21] : memref<128x256xf32, #tpu.memory_space<vmem>>, vector<4x256xf32>
    tpu.vector_store %arg7[%c20, %c0_21], %33 {strides = array<i32>} : memref<128x256xf32, #tpu.memory_space<vmem>>, vector<4x256xf32>,
    %c2_i32 = arith.constant 2 : i32
    %35 = arith.addi %4, %c2_i32 : i32
    %c0_22 = arith.constant 0 : index
    %36 = arith.index_cast %35 : i32 to index
    %c0_23 = arith.constant 0 : index
    %37 = vector.load %arg8[%c0_22, %36, %c0_23] : memref<4x18x18xf32, #tpu.memory_space<vmem>>, vector<4x16x16xf32>
    %38 = vector.shape_cast %37 : vector<4x16x16xf32> to vector<4x256xf32>
    %c24 = arith.constant 24 : index
    %c0_24 = arith.constant 0 : index
    %39 = vector.load %arg7[%c24, %c0_24] : memref<128x256xf32, #tpu.memory_space<vmem>>, vector<4x256xf32>
    tpu.vector_store %arg7[%c24, %c0_24], %38 {strides = array<i32>} : memref<128x256xf32, #tpu.memory_space<vmem>>, vector<4x256xf32>,
    %c2_i32_25 = arith.constant 2 : i32
    %40 = arith.addi %4, %c2_i32_25 : i32
    %c0_26 = arith.constant 0 : index
    %41 = arith.index_cast %40 : i32 to index
    %c1_27 = arith.constant 1 : index
    %42 = vector.load %arg8[%c0_26, %41, %c1_27] : memref<4x18x18xf32, #tpu.memory_space<vmem>>, vector<4x16x16xf32>
    %43 = vector.shape_cast %42 : vector<4x16x16xf32> to vector<4x256xf32>
    %c28 = arith.constant 28 : index
    %c0_28 = arith.constant 0 : index
    %44 = vector.load %arg7[%c28, %c0_28] : memref<128x256xf32, #tpu.memory_space<vmem>>, vector<4x256xf32>
    tpu.vector_store %arg7[%c28, %c0_28], %43 {strides = array<i32>} : memref<128x256xf32, #tpu.memory_space<vmem>>, vector<4x256xf32>,
    %c2_i32_29 = arith.constant 2 : i32
    %45 = arith.addi %4, %c2_i32_29 : i32
    %c0_30 = arith.constant 0 : index
    %46 = arith.index_cast %45 : i32 to index
    %c2_31 = arith.constant 2 : index
    %47 = vector.load %arg8[%c0_30, %46, %c2_31] : memref<4x18x18xf32, #tpu.memory_space<vmem>>, vector<4x16x16xf32>
    %48 = vector.shape_cast %47 : vector<4x16x16xf32> to vector<4x256xf32>
    %c32 = arith.constant 32 : index
    %c0_32 = arith.constant 0 : index
    %49 = vector.load %arg7[%c32, %c0_32] : memref<128x256xf32, #tpu.memory_space<vmem>>, vector<4x256xf32>
    tpu.vector_store %arg7[%c32, %c0_32], %48 {strides = array<i32>} : memref<128x256xf32, #tpu.memory_space<vmem>>, vector<4x256xf32>,
    %c0_33 = arith.constant 0 : index
    %c0_34 = arith.constant 0 : index
    %50 = vector.load %arg7[%c0_33, %c0_34] : memref<128x256xf32, #tpu.memory_space<vmem>>, vector<128x256xf32>
    %c0_35 = arith.constant 0 : index
    %c0_36 = arith.constant 0 : index
    %c0_37 = arith.constant 0 : index
    %51 = vector.load %arg4[%c0_35, %c0_36, %c0_37] : memref<1x8x128xf32, #tpu.memory_space<vmem>>, vector<1x8x128xf32>
    %52 = vector.shape_cast %51 : vector<1x8x128xf32> to vector<8x128xf32>
    %cst = arith.constant dense<0.000000e+00> : vector<8x256xf32>
    %53 = tpu.matmul %52, %50, %cst {dimension_numbers = #tpu.dot_dimension_numbers<[1], [0], [0], [1], [0, 0, 1, 1], [], []>} : vector<8x128xf32>, vector<128x256xf32>, vector<8x256xf32> -> vector<8x256xf32>
    %c0_38 = arith.constant 0 : index
    %c0_39 = arith.constant 0 : index
    %c0_40 = arith.constant 0 : index
    %54 = vector.load %arg5[%c0_38, %c0_39, %c0_40] : memref<1x8x1xf32, #tpu.memory_space<vmem>>, vector<1x8x1xf32>
    %55 = vector.shape_cast %54 : vector<1x8x1xf32> to vector<8x1xf32>
    %56 = vector.broadcast %55 : vector<8x1xf32> to vector<8x256xf32>
    %57 = arith.addf %53, %56 : vector<8x256xf32>
    %58 = vector.shape_cast %57 : vector<8x256xf32> to vector<8x16x16xf32>
    %c0_41 = arith.constant 0 : index
    %c0_42 = arith.constant 0 : index
    %c0_43 = arith.constant 0 : index
    %c0_44 = arith.constant 0 : index
    %c0_45 = arith.constant 0 : index
    %59 = vector.load %arg6[%c0_41, %c0_42, %c0_43, %c0_44, %c0_45] : memref<1x1x8x16x16xf32, #tpu.memory_space<vmem>>, vector<1x1x8x16x16xf32>
    %60 = vector.shape_cast %59 : vector<1x1x8x16x16xf32> to vector<8x16x16xf32>
    %61 = vector.shape_cast %58 : vector<8x16x16xf32> to vector<1x1x8x16x16xf32>
    tpu.vector_store %arg6[%c0_41, %c0_42, %c0_43, %c0_44, %c0_45], %61 {strides = array<i32>} : memref<1x1x8x16x16xf32, #tpu.memory_space<vmem>>, vector<1x1x8x16x16xf32>,
    return
  }
  func.func @transform_0(%arg0: i32, %arg1: i32, %arg2: i32) -> (i32, i32, i32, i32, i32) {
    %c0_i32 = arith.constant 0 : i32
    %c0_i32_0 = arith.constant 0 : i32
    %c0_i32_1 = arith.constant 0 : i32
    %c0_i32_2 = arith.constant 0 : i32
    return %arg1, %arg0, %c0_i32, %c0_i32_0, %c0_i32_1 : i32, i32, i32, i32, i32
  }
  func.func @transform_1(%arg0: i32, %arg1: i32, %arg2: i32) -> (i32, i32, i32) {
    %c0_i32 = arith.constant 0 : i32
    %c0_i32_0 = arith.constant 0 : i32
    %c0_i32_1 = arith.constant 0 : i32
    return %arg0, %c0_i32, %c0_i32_0 : i32, i32, i32
  }
  func.func @transform_2(%arg0: i32, %arg1: i32, %arg2: i32) -> (i32, i32, i32) {
    %c0_i32 = arith.constant 0 : i32
    %c0_i32_0 = arith.constant 0 : i32
    %c0_i32_1 = arith.constant 0 : i32
    return %arg0, %c0_i32, %c0_i32_0 : i32, i32, i32
  }
  func.func @transform_3(%arg0: i32, %arg1: i32, %arg2: i32) -> (i32, i32, i32, i32, i32) {
    %c0_i32 = arith.constant 0 : i32
    %c0_i32_0 = arith.constant 0 : i32
    %c0_i32_1 = arith.constant 0 : i32
    return %arg1, %arg0, %c0_i32, %arg2, %c0_i32_0 : i32, i32, i32, i32, i32
  }
}

</mosaic_0001>

<bundles_post_ra>
// kernel: tpu_custom_call.1
= control target key start
LH: loop header
LB: loop body
LE: loop exit
PB: predicated region body
PF: predicated region fallthrough
CT: control target
= control target key end

     0   :  { %8 = vsyncpa [#allocation5], 0  ;;  %s4755_s0 = inlined_call_operand.hbm [shape: f32[2,1,4,16,16], index: 0, kind: input, shape index: {}]   ;;  %s4756_s1 = inlined_call_operand.vmem [shape: f32[1,8,128], index: 1, kind: input, shape index: {}]   ;;  %s4757_s2 = inlined_call_operand.vmem [shape: f32[1,8,1], index: 2, kind: input, shape index: {}]   ;;  %s4758_s3 = inlined_call_operand.hbm [shape: f32[2,1,8,16,16], index: 3, kind: output, shape index: {}]  }
   0x1   :  { %10 = vsyncpa [#allocation5 + $0x1], 0 }
   0x2   :  { %11 = vsyncpa [#allocation6], 0 }
   0x3   :  { %13 = vsyncpa [#allocation6 + $0x1], 0  ;;  %s3140_s12 = smov 0   ;;  %s3142_s13 = smov 0  }
   0x4   :  { %s3144_s14 = smov 0   ;;  %s3146_s15 = smov 0  }
   0x5   :  { %s3148_s16 = smov 0   ;;  %s3150_s17 = smov 0  }
   0x6 LB: > { %s2838_s18 = sadd.s32 4294967295, %s3100_s17   ;;  %s2839_s19 = sadd.s32 4294967294, %s3100_s17   ;;  %s3100_s17 = sphi %s3150_s17, %s19_s17   ;;  %s3096_s16 = sphi %s3148_s16, %s4767_s16   ;;  %s3092_s15 = sphi %s3146_s15, %s4766_s15   ;;  %s3088_s14 = sphi %s3144_s14, %s4765_s14   ;;  %s3084_s13 = sphi %s3142_s13, %s4764_s13   ;;  %s3080_s12 = sphi %s3140_s12, %s4763_s12  }
   0x7   : > { %s34_s20 = sadd.s32 1, %s3096_s16  ;;  %s47_s21 = sadd.s32 1, %s3088_s14 }
   0x8   : > { %p36_p0 = scmp.ge.s32.totalorder %s34_s20, 2  ;;  %p54_p1 = scmp.ne.s32.totalorder %s3088_s14, %s3084_s13 }
   0x9   : > { %p55_p2 = scmp.eq.s32.totalorder %s3100_s17, 0  ;;  %p60_p3 = scmp.ne.s32.totalorder %s3084_s13, %s3080_s12 }
   0xa   : > { %s4769_s20 = smov (%p36_p0, %s34_s20), 0  ;;  %p61_p5 = scmp.eq.s32.totalorder %s2838_s18, 0 }
   0xb   : > { %p3181_p4 = por %p55_p2, %p54_p1  ;;  %s42_s23 = ssub.s32 %s3096_s16, %s4769_s20 }
   0xc   : > { %p140_p6 = scmp.eq.s32.totalorder %s2838_s18, 1  ;;  %p45_p7 = scmp.eq.s32.totalorder %s42_s23, 0 }
   0xd   : > { %p3187_p8 = por %p61_p5, %p60_p3  ;;  %p146_p10 = scmp.eq.s32.totalorder %s2839_s19, 1 }
   0xe   : > { %p3191_p9 = por %p140_p6, %p54_p1  ;;  %p2843_p12 = scmp.ge.s32.totalorder %s3100_s17, 2 }
   0xf   : > { %s3196_s26 = scalar_select %p45_p7, %s3088_s14, %s47_s21  }
  0x10   : > { %p3198_p11 = por %p146_p10, %p60_p3  ;;  %p2917_p13 = scmp.lt.s32.totalorder %s3100_s17, 2 }
  0x11   : > { %s180_s28 = sand.u32 1, %s3088_s14   ;;  %s2903_s30 = sshll.u32 %s3096_s16, 6 }
  0x12   : > { %s2844_s29 = sshll.u32 %s180_s28, 6  ;;  %s191_s6 = scalar_lea.hbm %s4755_s0, %s2903_s30 }
  0x13   : > { %s184_s7 = scalar_lea.vmem [#allocation4], %s2844_s29  ;;  %s192_s9 = sshll.u32 %s191_s6, 4  ;;  %s193_s9 = int_to_ptr.hbm [resolvable:$true] %s192_s9 }
  0x14   : > { %s194_s8 = sshll.u32 %s184_s7, 4  ;;  %p2910_p0 = pnand %p2917_p13, %p3181_p4  ;;  %s195_s8 = int_to_ptr.vmem [resolvable:$true] %s194_s8 }
  0x15   : > { %p2847_p1 = scmp.ge.s32.totalorder %s3100_s17, 1  ;;  %s181_s10 = scalar_lea.sflag [#allocation5], %s180_s28 }
  0x16   : > { %s3102_s11 = smov 128   ;;  %s3103_s18 = smov 8  }
  0x17   : > { %2912 = dma.hbm_to_vmem [thread:$0]  (!%p2910_p0), %s193_s9, 1024, %s195_s8, %s181_s10, %s3102_s11, %s3102_s11, %s3103_s18  }
  0x18   : > { %p202_p2 = scmp.lt.s32.totalorder %s3100_s17, 3 }
  0x1a   : > { %p203_p3 = pnand %p2847_p1, %p202_p2 }
  0x1b   : > { %s3214_s19 = sand.u32 (!%p203_p3), 1, %s3084_s13  }
  0x1c   : > { %206 = sbr.rel (%p203_p3) target bundleno = 1231 (0x4cf), region = 32  ;;  %s2848_s21 = sshll.u32 (!%p203_p3), %s3214_s19, 6 }
  0x1d   : > { %s209_s23 = scalar_lea.sflag (!%p203_p3), [#allocation5], %s3214_s19  ;;  %s3218_s29 = scalar_lea.vmem (!%p203_p3), [#allocation4], %s2848_s21 }
  0x21   : > { %3071 = dma.done.wait (%p3187_p8), %s209_s23, 1024  }
  0x22   : > { %3073 = vsyncadd (%p3187_p8), %s209_s23, 4294966272  ;;  %vm257_vm0 = vcmask 139264   ;;  %vm266_vm1 = vcmask 7168   ;;  %vm280_vm2 = vcmask 146568   ;;  %v3104_v0 = vmov 0.0   ;;  %v296_v1 = vld [vmem:[%s3218_s29 + $0x10] sm:$0xff] }
  0x23   : > { %260 = vst.msk [vmem:[#allocation3 + $0x30] sm:$0x1] %vm257_vm0, %v3104_v0  ;;  %2364 = vmatpush.msra.mxu0 %v3104_v0  ;;  %2384 = vmatpush.msra.mxu1 %v3104_v0  ;;  %v294_v2 = vld [vmem:[%s3218_s29] sm:$0xff]  ;;  %s3105_s22 = smov 1   ;;  %v297_v4 = vld [vmem:[%s3218_s29 + $0x18] sm:$0xff]  ;;  %v295_v5 = vld [vmem:[%s3218_s29 + $0x8] sm:$0xff] }
  0x24   : > { %274 = vst.msk [vmem:[#allocation3 + $0x30] sm:$0xff] %vm266_vm1, %v3104_v0  ;;  %314 = vrot.lane.b32.xlu1 %v296_v1, %s3105_s22  ;;  %310 = vrot.lane.b32.xlu0 %v294_v2, %s3105_s22  ;;  %v298_v3 = vld [vmem:[%s3218_s29 + $0x20] sm:$0xff]  ;;  %v299_v6 = vld [vmem:[%s3218_s29 + $0x28] sm:$0xff]  ;;  %vm269_vm3 = vcmask 1024   ;;  %vm283_vm4 = vcmask 140424   ;;  %vm334_vm5 = vcmask 138248  }
  0x25   : > { %275 = vst.msk [vmem:[#allocation3 + $0x38] sm:$0xff] %vm266_vm1, %v3104_v0  ;;  %2365 = vmatpush.msra.mxu0 %v3104_v0  ;;  %2385 = vmatpush.msra.mxu1 %v3104_v0  ;;  %v301_v7 = vld [vmem:[%s3218_s29 + $0x38] sm:$0xff]  ;;  %v300_v8 = vld [vmem:[%s3218_s29 + $0x30] sm:$0xff]  ;;  %s3106_s24 = smov 127   ;;  %s3107_s28 = smov 126   ;;  %vm378_vm6 = vcmask 1047556  }
  0x26   : > { %288 = vst.msk [vmem:[#allocation3 + $0x30] sm:$0xff] %vm280_vm2, %v3104_v0  ;;  %318 = vrot.lane.b32.xlu2 %v298_v3, %s3105_s22  ;;  %v3108_v25 = vmov 1983009808   ;;  %v3109_v40 = vmov 1934713408   ;;  %s3110_s30 = smov 32  }
  0x27   : > { %289 = vst.msk [vmem:[#allocation3 + $0x38] sm:$0xff] %vm280_vm2, %v3104_v0  ;;  %2366 = vmatpush.msra.mxu0 %v3104_v0  ;;  %2386 = vmatpush.msra.mxu1 %v3104_v0  ;;  %v383_v26 = vunpack.c.l.s4 %v3108_v25  ;;  %v407_v41 = vunpack.c.l.s4 %v3109_v40  ;;  %s3111_s4 = smov 96   ;;  %s3112_s5 = smov 64   ;;  %vm546_vm7 = vcmask 130048   ;;  %vm548_vm8 = vcmask 261120  }
  0x28   : > { %258 = vst.msk [vmem:[#allocation3] sm:$0x1] %vm257_vm0, %v3104_v0  ;;  %s3113_s6 = smov 80   ;;  %s3114_s7 = smov 48   ;;  %vm550_vm9 = vcmask 392192   ;;  %vm552_vm10 = vcmask 523264  }
  0x29   : > { %259 = vst.msk [vmem:[#allocation3 + $0x18] sm:$0x1] %vm257_vm0, %v3104_v0  ;;  %2367 = vmatpush.msra.mxu0 %v3104_v0  ;;  %2387 = vmatpush.msra.mxu1 %v3104_v0  ;;  %v3342_v30 = vunpack.c.0.s8 %v383_v26  ;;  %v3369_v51 = vunpack.c.0.s8 %v407_v41  ;;  %s3115_s8 = smov 16   ;;  %s3116_s9 = smov 112   ;;  %vm554_vm11 = vcmask 654336   ;;  %vm556_vm12 = vcmask 785408  }
  0x2a   : > { %261 = vst.msk [vmem:[#allocation3 + $0x48] sm:$0x1] %vm257_vm0, %v3104_v0  ;;  %vm558_vm13 = vcmask 916480   ;;  %s2849_s23 = sshll.u32 %s3214_s19, 7  ;;  %s3038_s10 = scalar_lea.hbm %s4758_s3, 256 }
  0x2b   : > { %262 = vst.msk [vmem:[#allocation3 + $0x11] sm:$0x1] %vm257_vm0, %v3104_v0  ;;  %2368 = vmatpush.msra.mxu0 %v3104_v0  ;;  %2388 = vmatpush.msra.mxu1 %v3104_v0  ;;  %s4635_s29 = scalar_lea.vmem [#allocation7], %s2849_s23 }
  0x2c   : > { %263 = vst.msk [vmem:[#allocation3 + $0x29] sm:$0x1] %vm257_vm0, %v3104_v0  ;;  %316 = vrot.lane.b32.xlu1 %v297_v4, %s3105_s22  ;;  %312 = vrot.lane.b32.xlu0 %v295_v5, %s3105_s22 }
  0x2d   : > { %264 = vst.msk [vmem:[#allocation3 + $0x41] sm:$0x1] %vm257_vm0, %v3104_v0  ;;  %2369 = vmatpush.msra.mxu0 %v3104_v0  ;;  %2389 = vmatpush.msra.mxu1 %v3104_v0 }
  0x2e   : > { %265 = vst.msk [vmem:[#allocation3 + $0x59] sm:$0x1] %vm257_vm0, %v3104_v0  ;;  %320 = vrot.lane.b32.xlu2 %v299_v6, %s3105_s22 }
  0x2f   : > { %268 = vst.msk [vmem:[#allocation3 + $0x8] sm:$0xff] %vm266_vm1, %v3104_v0  ;;  %2370 = vmatpush.msra.mxu0 %v3104_v0  ;;  %2390 = vmatpush.msra.mxu1 %v3104_v0 }
  0x30   : > { %272 = vst.msk [vmem:[#allocation3 + $0x20] sm:$0xff] %vm266_vm1, %v3104_v0 }
  0x31   : > { %278 = vst.msk [vmem:[#allocation3 + $0x50] sm:$0xff] %vm266_vm1, %v3104_v0  ;;  %2371 = vmatpush.msra.mxu0 %v3104_v0  ;;  %2391 = vmatpush.msra.mxu1 %v3104_v0 }
  0x32   : > { %343 = vst [vmem:[#allocation2 + $0xf0] sm:$0xf0] %v3104_v0 }
  0x33   : > { %344 = vst [vmem:[#allocation2 + $0x40] sm:$0xf0] %v3104_v0  ;;  %2372 = vmatpush.msra.mxu0 %v3104_v0  ;;  %2392 = vmatpush.msra.mxu1 %v3104_v0 }
  0x34   : > { %324 = vrot.lane.b32.xlu1 %v301_v7, %s3105_s22  ;;  %322 = vrot.lane.b32.xlu0 %v300_v8, %s3105_s22  ;;  %267 = vst.msk [vmem:[#allocation3] sm:$0xff] %vm266_vm1, %v3104_v0  ;;  %s2904_s22 = sshll.u32 %s3092_s15, 7 }
  0x35   : > { %2373 = vmatpush.msra.mxu0 %v3104_v0  ;;  %2393 = vmatpush.msra.mxu1 %v3104_v0  ;;  %271 = vst.msk [vmem:[#allocation3 + $0x18] sm:$0xff] %vm266_vm1, %v3104_v0 }
  0x36   : > { %277 = vst.msk [vmem:[#allocation3 + $0x48] sm:$0xff] %vm266_vm1, %v3104_v0 }
  0x37   : > { %2374 = vmatpush.msra.mxu0 %v3104_v0  ;;  %2394 = vmatpush.msra.mxu1 %v3104_v0  ;;  %282 = vst.msk [vmem:[#allocation3 + $0x8] sm:$0xff] %vm280_vm2, %v3104_v0 }
  0x38   : > { %286 = vst.msk [vmem:[#allocation3 + $0x20] sm:$0xff] %vm280_vm2, %v3104_v0 }
  0x39   : > { %292 = vst.msk [vmem:[#allocation3 + $0x50] sm:$0xff] %vm280_vm2, %v3104_v0 }
  0x3a   : > { %285 = vst.msk [vmem:[#allocation3 + $0x18] sm:$0xff] %vm280_vm2, %v3104_v0 }
  0x3b   : > { %281 = vst.msk [vmem:[#allocation3] sm:$0xff] %vm280_vm2, %v3104_v0 }
  0x3c   : > { %291 = vst.msk [vmem:[#allocation3 + $0x48] sm:$0xff] %vm280_vm2, %v3104_v0 }
  0x3d   : > { %276 = vst.msk [vmem:[#allocation3 + $0x40] sm:$0x3] %vm269_vm3, %v3104_v0 }
  0x3e   : > { %290 = vst.msk [vmem:[#allocation3 + $0x40] sm:$0x3] %vm283_vm4, %v3104_v0 }
  0x3f   : > { %270 = vst.msk [vmem:[#allocation3 + $0x10] sm:$0x3] %vm269_vm3, %v3104_v0 }
  0x40   : > { %273 = vst.msk [vmem:[#allocation3 + $0x28] sm:$0x3] %vm269_vm3, %v3104_v0 }
  0x41   : > { %279 = vst.msk [vmem:[#allocation3 + $0x58] sm:$0x3] %vm269_vm3, %v3104_v0 }
  0x42   : > { %284 = vst.msk [vmem:[#allocation3 + $0x10] sm:$0x3] %vm283_vm4, %v3104_v0 }
  0x43   : > { %287 = vst.msk [vmem:[#allocation3 + $0x28] sm:$0x3] %vm283_vm4, %v3104_v0 }
  0x44   : > { %293 = vst.msk [vmem:[#allocation3 + $0x58] sm:$0x3] %vm283_vm4, %v3104_v0 }
  0x80   : > { %v319_v9 = vpop.permute.xlu2 %318 }
  0x81   : > { %339 = vst.msk [vmem:[#allocation3 + $0x31] sm:$0xff] %vm334_vm5, %v319_v9 }
  0x88   : > { %v321_v10 = vpop.permute.xlu2 %320  ;;  %v573_v22 = vld [vmem:[#allocation3 + $0x30] sm:$0xff] }
  0x89   : > { %340 = vst.msk [vmem:[#allocation3 + $0x39] sm:$0xff] %vm334_vm5, %v321_v10  ;;  %v377_v27 = vrot.slane %v573_v22, 4  ;;  %v3379_v56 = vld [vmem:[#allocation3 + $0x31] sm:$0xff] }
  0x8a   : > { %v1033_v2 = vrot.slane %v3379_v56, 4 }
  0x90   : > { %v574_v19 = vld [vmem:[#allocation3 + $0x38] sm:$0xff] }
  0x91   : > { %v434_v47 = vrot.slane %v574_v19, 4  ;;  %v3441_v25 = vld [vmem:[#allocation3 + $0x39] sm:$0xff] }
  0x96   : > { %v315_v11 = vpop.permute.xlu1 %314  ;;  %v311_v12 = vpop.permute.xlu0 %310 }
  0x97   : > { %337 = vst.msk [vmem:[#allocation3 + $0x19] sm:$0xff] %vm334_vm5, %v315_v11 }
  0x98   : > { %335 = vst.msk [vmem:[#allocation3 + $0x1] sm:$0xff] %vm334_vm5, %v311_v12 }
  0x9e   : > { %v317_v13 = vpop.permute.xlu1 %316  ;;  %v313_v14 = vpop.permute.xlu0 %312  ;;  %v571_v15 = vld [vmem:[#allocation3 + $0x18] sm:$0xff] }
  0x9f   : > { %338 = vst.msk [vmem:[#allocation3 + $0x21] sm:$0xff] %vm334_vm5, %v317_v13  ;;  %589 = vrot.lane.b32.xlu0 %v571_v15, %s3106_s24  ;;  %v569_v16 = vld [vmem:[#allocation3] sm:$0xff]  ;;  %v392_v33 = vrot.slane %v571_v15, 4 }
  0xa0   : > { %336 = vst.msk [vmem:[#allocation3 + $0x9] sm:$0xff] %vm334_vm5, %v313_v14  ;;  %585 = vrot.lane.b32.xlu1 %v569_v16, %s3106_s24  ;;  %v380_v28 = vrot.slane %v569_v16, 4  ;;  %v379_v31 = vsel %vm378_vm6, %v377_v27, %v569_v16  ;;  %v2860_v43 = vld [vmem:[#allocation3 + $0x19] sm:$0xff]  ;;  %v2858_v0 = vld [vmem:[#allocation3 + $0x1] sm:$0xff] }
  0xa1   : > { %v3349_v36 = vperm.slane %v379_v31, %v3342_v30  ;;  %v1047_v62 = vrot.slane %v2860_v43, 4  ;;  %v1035_v9 = vrot.slane %v2858_v0, 4  ;;  %v1034_v11 = vsel %vm378_vm6, %v1033_v2, %v2858_v0 }
  0xa2   : > { %v381_v32 = vsel %vm378_vm6, %v573_v22, %v380_v28 }
  0xa3   : > { %v3352_v37 = vperm.slane %v381_v32, %v3342_v30  ;;  %v404_v46 = vrot.slane %v3349_v36, 4 }
  0xa5   : > { %v416_v49 = vrot.slane %v3352_v37, 4 }
  0xa6   : > { %v325_v17 = vpop.permute.xlu1 %324  ;;  %v323_v18 = vpop.permute.xlu0 %322  ;;  %v572_v20 = vld [vmem:[#allocation3 + $0x20] sm:$0xff] }
  0xa7   : > { %342 = vst.msk [vmem:[#allocation3 + $0x51] sm:$0xff] %vm334_vm5, %v325_v17  ;;  %595 = vrot.lane.b32.xlu0 %v574_v19, %s3106_s24  ;;  %v570_v21 = vld [vmem:[#allocation3 + $0x8] sm:$0xff]  ;;  %v448_v38 = vrot.slane %v572_v20, 4  ;;  %v3421_v17 = vperm.slane %v1034_v11, %v3342_v30 }
  0xa8   : > { %341 = vst.msk [vmem:[#allocation3 + $0x49] sm:$0xff] %vm334_vm5, %v323_v18  ;;  %587 = vrot.lane.b32.xlu2 %v570_v21, %s3106_s24  ;;  %591 = vrot.lane.b32.xlu1 %v572_v20, %s3106_s24  ;;  %v3354_v39 = vld [vmem:[#allocation3 + $0x9] sm:$0xff]  ;;  %v436_v50 = vrot.slane %v570_v21, 4  ;;  %v435_v53 = vsel %vm378_vm6, %v434_v47, %v570_v21  ;;  %v3407_v8 = vld [vmem:[#allocation3 + $0x21] sm:$0xff]  ;;  %v1036_v18 = vsel %vm378_vm6, %v3379_v56, %v1035_v9 }
  0xa9   : > { %v3388_v60 = vperm.slane %v435_v53, %v3342_v30  ;;  %v1059_v27 = vrot.slane %v3421_v17, 4 }
  0xaa   : > { %v437_v61 = vsel %vm378_vm6, %v574_v19, %v436_v50 }
  0xab   : > { %v445_v5 = vperm.slane %v437_v61, %v3342_v30  ;;  %v460_v7 = vrot.slane %v3388_v60, 4  ;;  %v1089_v61 = vrot.slane %v3441_v25, 4 }
  0xad   : > { %v472_v50 = vrot.slane %v445_v5, 4 }
  0xaf   : > { %817 = vrot.lane.b32.xlu0 %v570_v21, %s3107_s28  ;;  %v575_v23 = vld [vmem:[#allocation3 + $0x48] sm:$0xff]  ;;  %v576_v24 = vld [vmem:[#allocation3 + $0x50] sm:$0xff] }
  0xb0   : > { %593 = vrot.lane.b32.xlu2 %v573_v22, %s3106_s24  ;;  %597 = vrot.lane.b32.xlu1 %v575_v23, %s3106_s24  ;;  %v390_v29 = vrot.slane %v575_v23, 4  ;;  %v393_v35 = vsel %vm378_vm6, %v575_v23, %v392_v33  ;;  %v449_v45 = vsel %vm378_vm6, %v576_v24, %v448_v38  ;;  %v446_v48 = vrot.slane %v576_v24, 4  ;;  %v3382_v58 = vld [vmem:[#allocation3 + $0x49] sm:$0xff] }
  0xb1   : > { %v3362_v44 = vperm.slane %v393_v35, %v3342_v30  ;;  %v3375_v54 = vperm.slane %v449_v45, %v3342_v30  ;;  %v1048_v4 = vsel %vm378_vm6, %v3382_v58, %v1047_v62  ;;  %v1045_v6 = vrot.slane %v3382_v58, 4 }
  0xb2   : > { %v391_v34 = vsel %vm378_vm6, %v390_v29, %v571_v15  ;;  %v447_v57 = vsel %vm378_vm6, %v446_v48, %v572_v20  ;;  %v3412_v12 = vperm.slane %v1048_v4, %v3342_v30 }
  0xb3   : > { %v3357_v42 = vperm.slane %v391_v34, %v3342_v30  ;;  %v417_v55 = vsel %vm378_vm6, %v3362_v44, %v416_v49  ;;  %v470_v1 = vrot.slane %v3375_v54, 4  ;;  %v453_v3 = vperm.slane %v447_v57, %v3342_v30 }
  0xb4   : > { %v3392_v63 = vperm.slane %v417_v55, %v3369_v51  ;;  %v1046_v14 = vsel %vm378_vm6, %v1045_v6, %v2860_v43  ;;  %v414_v40 = vrot.slane %v3362_v44, 4 }
  0xb5   : > { %v405_v52 = vsel %vm378_vm6, %v3357_v42, %v404_v46  ;;  %v471_v10 = vsel %vm378_vm6, %v470_v1, %v445_v5  ;;  %v461_v13 = vsel %vm378_vm6, %v453_v3, %v460_v7  ;;  %v458_v49 = vrot.slane %v453_v3, 4 }
  0xb6   : > { %v3385_v59 = vperm.slane %v405_v52, %v3369_v51  ;;  %v3429_v21 = vperm.slane %v461_v13, %v3369_v51  ;;  %v415_v46 = vsel %vm378_vm6, %v414_v40, %v3352_v37  ;;  %v473_v37 = vsel %vm378_vm6, %v3375_v54, %v472_v50 }
  0xb7   : > { %823 = vrot.lane.b32.xlu0 %v573_v22, %s3107_s28  ;;  %v1069_v22 = vrot.slane %v3412_v12, 4  ;;  %v421_v44 = vperm.slane %v415_v46, %v3369_v51  ;;  %v459_v55 = vsel %vm378_vm6, %v458_v49, %v3388_v60  ;;  %v481_v62 = vperm.slane %v473_v37, %v3369_v51 }
  0xb8   : > { %599 = vrot.lane.b32.xlu2 %v576_v24, %s3106_s24  ;;  %819 = vrot.lane.b32.xlu1 %v571_v15, %s3107_s28  ;;  %v1103_v15 = vrot.slane %v3407_v8, 4  ;;  %v428_v53 = vrot.slane %v3385_v59, 4  ;;  %v3492_v1 = vperm.slane %v459_v55, %v3369_v51  ;;  %v1090_v3 = vsel %vm378_vm6, %v1089_v61, %v3354_v39 }
  0xb9   : > { %v430_v52 = vrot.slane %v421_v44, 4  ;;  %v1096_v7 = vperm.slane %v1090_v3, %v3342_v30  ;;  %v402_v13 = vrot.slane %v3357_v42, 4 }
  0xba   : > { %v429_v54 = vsel %vm378_vm6, 0.0, %v428_v53  ;;  %v482_v2 = vrot.slane %v3492_v1, 4  ;;  %v484_v53 = vrot.slane %v3429_v21, 4 }
  0xbc   : > { %v485_v61 = vsel %vm378_vm6, 0.0, %v484_v53 }
  0xbf   : > { %829 = vrot.lane.b32.xlu0 %v576_v24, %s3107_s28  ;;  %v1044_v24 = vperm.slane %v1036_v18, %v3342_v30 }
  0xc0   : > { %815 = vrot.lane.b32.xlu2 %v569_v16, %s3107_s28  ;;  %825 = vrot.lane.b32.xlu1 %v574_v19, %s3107_s28  ;;  %v3418_v16 = vperm.slane %v471_v10, %v3369_v51  ;;  %v3425_v19 = vld [vmem:[#allocation3 + $0x51] sm:$0xff]  ;;  %v483_v10 = vsel %vm378_vm6, 0.0, %v482_v2 }
  0xc1   : > { %v1104_v26 = vsel %vm378_vm6, %v3425_v19, %v1103_v15  ;;  %v1070_v29 = vsel %vm378_vm6, %v1069_v22, %v1044_v24  ;;  %v1101_v57 = vrot.slane %v3425_v19, 4  ;;  %v488_v15 = vrot.slane %v481_v62, 4 }
  0xc2   : > { %v1112_v32 = vperm.slane %v1104_v26, %v3342_v30  ;;  %v3454_v34 = vperm.slane %v1070_v29, %v3369_v51  ;;  %v486_v5 = vrot.slane %v3418_v16, 4 }
  0xc3   : > { %v1102_v60 = vsel %vm378_vm6, %v1101_v57, %v3407_v8  ;;  %v489_v26 = vsel %vm378_vm6, 0.0, %v488_v15 }
  0xc4   : > { %v1125_v38 = vrot.slane %v1112_v32, 4  ;;  %v1108_v6 = vperm.slane %v1102_v60, %v3342_v30  ;;  %v487_v11 = vsel %vm378_vm6, 0.0, %v486_v5  ;;  %v1085_v18 = vrot.slane %v3454_v34, 4 }
  0xc7   : > { %1241 = vrot.lane.b32.xlu0 %v3354_v39, %s3106_s24 }
  0xc8   : > { %821 = vrot.lane.b32.xlu2 %v572_v20, %s3107_s28  ;;  %1243 = vrot.lane.b32.xlu1 %v2860_v43, %s3106_s24  ;;  %v1091_v20 = vrot.slane %v3354_v39, 4 }
  0xca   : > { %v1092_v28 = vsel %vm378_vm6, %v3441_v25, %v1091_v20 }
  0xcb   : > { %v1100_v33 = vperm.slane %v1092_v28, %v3342_v30 }
  0xcd   : > { %v1127_v41 = vrot.slane %v1100_v33, 4  ;;  %v1126_v45 = vsel %vm378_vm6, %v1125_v38, %v1100_v33 }
  0xce   : > { %v3474_v48 = vperm.slane %v1126_v45, %v3369_v51 }
  0xcf   : > { %495 = vrot.lane.b32.xlu0 %v3385_v59, %s3110_s30  ;;  %v1128_v43 = vsel %vm378_vm6, %v1112_v32, %v1127_v41  ;;  %v1071_v59 = vrot.slane %v1044_v24, 4 }
  0xd0   : > { %827 = vrot.lane.b32.xlu2 %v575_v23, %s3107_s28  ;;  %511 = vrot.lane.b32.xlu1 %v3392_v63, %s3111_s4  ;;  %v3435_v23 = vperm.slane %v1046_v14, %v3342_v30  ;;  %v3471_v47 = vperm.slane %v1128_v43, %v3369_v51  ;;  %v1115_v14 = vrot.slane %v1096_v7, 4  ;;  %v432_v43 = vrot.slane %v3392_v63, 4 }
  0xd1   : > { %v1072_v4 = vsel %vm378_vm6, %v3412_v12, %v1071_v59  ;;  %v1113_v12 = vrot.slane %v1108_v6, 4 }
  0xd2   : > { %v1060_v31 = vsel %vm378_vm6, %v3435_v23, %v1059_v27  ;;  %v1080_v9 = vperm.slane %v1072_v4, %v3369_v51  ;;  %v1057_v39 = vrot.slane %v3435_v23, 4  ;;  %v403_v23 = vsel %vm378_vm6, %v402_v13, %v3349_v36 }
  0xd3   : > { %v3457_v35 = vperm.slane %v1060_v31, %v3369_v51  ;;  %v1114_v22 = vsel %vm378_vm6, %v1113_v12, %v1096_v7  ;;  %v1086_v27 = vsel %vm378_vm6, 0.0, %v1085_v18  ;;  %v433_v46 = vsel %vm378_vm6, 0.0, %v432_v43 }
  0xd4   : > { %v1058_v20 = vsel %vm378_vm6, %v1057_v39, %v3421_v17  ;;  %v3531_v28 = vperm.slane %v1114_v22, %v3369_v51  ;;  %v3534_v17 = vperm.slane %v403_v23, %v3369_v51  ;;  %v1087_v41 = vrot.slane %v1080_v9, 4 }
  0xd5   : > { %v3526_v42 = vperm.slane %v1058_v20, %v3369_v51  ;;  %v1143_v37 = vrot.slane %v3471_v47, 4  ;;  %v1083_v59 = vrot.slane %v3457_v35, 4  ;;  %v1141_v18 = vrot.slane %v3474_v48, 4 }
  0xd6   : > { %v1137_v31 = vrot.slane %v3531_v28, 4  ;;  %v426_v32 = vrot.slane %v3534_v17, 4  ;;  %v1088_v45 = vsel %vm378_vm6, 0.0, %v1087_v41 }
  0xd7   : > { %531 = vrot.lane.b32.xlu0 %v3418_v16, %s3112_s5  ;;  %v1116_v16 = vsel %vm378_vm6, %v1108_v6, %v1115_v14  ;;  %v1081_v29 = vrot.slane %v3526_v42, 4  ;;  %v1144_v57 = vsel %vm378_vm6, 0.0, %v1143_v37 }
  0xd8   : > { %1239 = vrot.lane.b32.xlu2 %v2858_v0, %s3106_s24  ;;  %523 = vrot.lane.b32.xlu1 %v3429_v21, %s3110_s30  ;;  %v431_v0 = vsel %vm378_vm6, 0.0, %v430_v52  ;;  %v1124_v24 = vperm.slane %v1116_v16, %v3369_v51  ;;  %v427_v38 = vsel %vm378_vm6, 0.0, %v426_v32 }
  0xd9   : > { %v1082_v33 = vsel %vm378_vm6, 0.0, %v1081_v29 }
  0xda   : > { %v1139_v52 = vrot.slane %v1124_v24, 4 }
  0xdc   : > { %v1140_v63 = vsel %vm378_vm6, 0.0, %v1139_v52 }
  0xdf   : > { %1158 = vrot.lane.b32.xlu0 %v3454_v34, %s3112_s5  ;;  %v1138_v34 = vsel %vm378_vm6, 0.0, %v1137_v31 }
  0xe0   : > { %1245 = vrot.lane.b32.xlu2 %v3407_v8, %s3106_s24  ;;  %1150 = vrot.lane.b32.xlu1 %v3457_v35, %s3110_s30  ;;  %v1084_v35 = vsel %vm378_vm6, 0.0, %v1083_v59 }
  0xe7   : > { %1194 = vrot.lane.b32.xlu0 %v3471_v47, %s3111_s4 }
  0xe8   : > { %1186 = vrot.lane.b32.xlu1 %v3474_v48, %s3112_s5  ;;  %503 = vrot.lane.b32.xlu2 %v421_v44, %s3112_s5  ;;  %v1142_v48 = vsel %vm378_vm6, 0.0, %v1141_v18 }
  0xef   : > { %507 = vrot.lane.b32.xlu0 %v431_v0, %s3113_s6 }
  0xf0   : > { %539 = vrot.lane.b32.xlu2 %v481_v62, %s3111_s4  ;;  %499 = vrot.lane.b32.xlu1 %v429_v54, %s3114_s7 }
  0xf7   : > { %519 = vrot.lane.b32.xlu0 %v483_v10, %s3115_s8 }
  0xf8   : > { %1166 = vrot.lane.b32.xlu2 %v1080_v9, %s3111_s4  ;;  %535 = vrot.lane.b32.xlu1 %v487_v11, %s3113_s6 }
  0xff   : > { %543 = vrot.lane.b32.xlu0 %v489_v26, %s3116_s9 }
 0x100   : > { %1178 = vrot.lane.b32.xlu2 %v1124_v24, %s3110_s30  ;;  %1162 = vrot.lane.b32.xlu1 %v1086_v27, %s3113_s6 }
 0x102   : > { %v3538_v36 = vpop.permute.xlu2 %587 }
 0x103   : > { %v667_v20 = vrot.slane %v3538_v36, 4 }
 0x107   : > { %1146 = vrot.lane.b32.xlu0 %v1082_v33, %s3115_s8 }
 0x108   : > { %1174 = vrot.lane.b32.xlu1 %v1138_v34, %s3115_s8  ;;  %491 = vrot.lane.b32.xlu2 %v427_v38, %s3115_s8 }
 0x10a   : > { %v594_v40 = vpop.permute.xlu2 %593 }
 0x10b   : > { %v609_v60 = vrot.slane %v594_v40, 4 }
 0x10f   : > { %1170 = vrot.lane.b32.xlu0 %v1088_v45, %s3116_s9 }
 0x110   : > { %1249 = vrot.lane.b32.xlu1 %v3441_v25, %s3106_s24  ;;  %515 = vrot.lane.b32.xlu2 %v433_v46, %s3116_s9 }
 0x111   : > { %v590_v44 = vpop.permute.xlu0 %589 }
 0x112   : > { %v600_v49 = vpop.permute.xlu2 %599  ;;  %v586_v50 = vpop.permute.xlu1 %585  ;;  %v623_v10 = vrot.slane %v590_v44, 4 }
 0x113   : > { %v677_v55 = vrot.slane %v600_v49, 4  ;;  %v610_v5 = vsel %vm378_vm6, %v609_v60, %v586_v50  ;;  %v611_v11 = vrot.slane %v586_v50, 4 }
 0x114   : > { %v616_v39 = vperm.slane %v610_v5, %v3342_v30 }
 0x115   : > { %v612_v23 = vsel %vm378_vm6, %v594_v40, %v611_v11 }
 0x116   : > { %v635_v24 = vrot.slane %v616_v39, 4 }
 0x117   : > { %1182 = vrot.lane.b32.xlu0 %v1140_v63, %s3114_s7 }
 0x118   : > { %1198 = vrot.lane.b32.xlu1 %v1144_v57, %s3116_s9  ;;  %527 = vrot.lane.b32.xlu2 %v485_v61, %s3114_s7 }
 0x119   : > { %v596_v62 = vpop.permute.xlu0 %595 }
 0x11a   : > { %v665_v0 = vrot.slane %v596_v62, 4  ;;  %v3564_v54 = vpop.permute.xlu2 %815  ;;  %v592_v47 = vpop.permute.xlu1 %591  ;;  %v668_v27 = vsel %vm378_vm6, %v596_v62, %v667_v20 }
 0x11b   : > { %v678_v21 = vsel %vm378_vm6, %v677_v55, %v592_v47  ;;  %v679_v7 = vrot.slane %v592_v47, 4  ;;  %v676_v38 = vperm.slane %v668_v27, %v3342_v30  ;;  %v841_v53 = vrot.slane %v3564_v54, 4 }
 0x11c   : > { %v666_v2 = vsel %vm378_vm6, %v665_v0, %v3538_v36  ;;  %v3571_v3 = vperm.slane %v678_v21, %v3342_v30  ;;  %v620_v36 = vperm.slane %v612_v23, %v3342_v30 }
 0x11d   : > { %v3574_v4 = vperm.slane %v666_v2, %v3342_v30  ;;  %v680_v15 = vsel %vm378_vm6, %v600_v49, %v679_v7  ;;  %v703_v63 = vrot.slane %v676_v38, 4 }
 0x11e   : > { %v689_v6 = vrot.slane %v3571_v3, 4  ;;  %v688_v29 = vperm.slane %v680_v15, %v3342_v30 }
 0x11f   : > { %1247 = vrot.lane.b32.xlu0 %v3379_v56, %s3106_s24 }
 0x120   : > { %1154 = vrot.lane.b32.xlu2 %v1084_v35, %s3114_s7  ;;  %v3584_v9 = vsel %vm378_vm6, %v689_v6, %v3574_v4  ;;  %v704_v7 = vsel %vm378_vm6, %v688_v29, %v703_v63  ;;  %v647_v35 = vrot.slane %v620_v36, 4 }
 0x121   : > { %v3587_v12 = vpop.permute.xlu0 %817  ;;  %v3658_v27 = vperm.slane %v704_v7, %v3369_v51 }
 0x122   : > { %v3589_v13 = vpop.permute.xlu2 %821  ;;  %v598_v14 = vpop.permute.xlu1 %597  ;;  %v897_v2 = vrot.slane %v3587_v12, 4 }
 0x123   : > { %v621_v56 = vrot.slane %v598_v14, 4  ;;  %v624_v16 = vsel %vm378_vm6, %v598_v14, %v623_v10 }
 0x124   : > { %v632_v22 = vperm.slane %v624_v16, %v3342_v30 }
 0x125   : > { %v622_v26 = vsel %vm378_vm6, %v621_v56, %v590_v44  ;;  %v701_v44 = vrot.slane %v688_v29, 4 }
 0x126   : > { %v628_v31 = vperm.slane %v622_v26, %v3342_v30  ;;  %v645_v32 = vrot.slane %v632_v22, 4  ;;  %v648_v18 = vsel %vm378_vm6, %v632_v22, %v647_v35 }
 0x127   : > { %1253 = vrot.lane.b32.xlu0 %v3425_v19, %s3106_s24  ;;  %v702_v47 = vsel %vm378_vm6, %v701_v44, %v676_v38 }
 0x128   : > { %v633_v33 = vrot.slane %v628_v31, 4  ;;  %1190 = vrot.lane.b32.xlu2 %v1142_v48, %s3113_s6  ;;  %v636_v34 = vsel %vm378_vm6, %v628_v31, %v635_v24  ;;  %v646_v46 = vsel %vm378_vm6, %v645_v32, %v620_v36  ;;  %v3638_v6 = vperm.slane %v702_v47, %v3369_v51 }
 0x129   : > { %v824_v40 = vpop.permute.xlu0 %823  ;;  %v3609_v41 = vperm.slane %v636_v34, %v3369_v51  ;;  %v3621_v61 = vperm.slane %v646_v46, %v3369_v51  ;;  %v3662_v32 = vperm.slane %v648_v18, %v3369_v51  ;;  %v909_v48 = vrot.slane %v3589_v13, 4 }
 0x12a   : > { %v828_v43 = vpop.permute.xlu2 %827  ;;  %v820_v45 = vpop.permute.xlu1 %819  ;;  %v3613_v49 = vsel %vm378_vm6, %v633_v33, %v616_v39  ;;  %v839_v50 = vrot.slane %v824_v40, 4  ;;  %v842_v59 = vsel %vm378_vm6, %v824_v40, %v841_v53  ;;  %v691_v33 = vrot.slane %v3574_v4, 4 }
 0x12b   : > { %v851_v52 = vrot.slane %v828_v43, 4  ;;  %v853_v37 = vrot.slane %v820_v45, 4  ;;  %726 = vrot.lane.b32.xlu1 %v3609_v41, %s3110_s30  ;;  %v850_v10 = vperm.slane %v842_v59, %v3342_v30 }
 0x12c   : > { %v840_v21 = vsel %vm378_vm6, %v839_v50, %v3564_v54  ;;  %v692_v44 = vsel %vm378_vm6, %v3571_v3, %v691_v33 }
 0x12d   : > { %v852_v55 = vsel %vm378_vm6, %v851_v52, %v820_v45  ;;  %v854_v57 = vsel %vm378_vm6, %v828_v43, %v853_v37  ;;  %v846_v54 = vperm.slane %v840_v21, %v3342_v30  ;;  %v877_v29 = vrot.slane %v850_v10, 4 }
 0x12e   : > { %v3624_v62 = vperm.slane %v852_v55, %v3342_v30  ;;  %v862_v0 = vperm.slane %v854_v57, %v3342_v30  ;;  %v3695_v37 = vperm.slane %v692_v44, %v3369_v51 }
 0x12f   : > { %734 = vrot.lane.b32.xlu0 %v3621_v61, %s3112_s5  ;;  %v865_v55 = vrot.slane %v846_v54, 4 }
 0x130   : > { %v863_v60 = vrot.slane %v3624_v62, 4  ;;  %1251 = vrot.lane.b32.xlu2 %v3382_v58, %s3106_s24  ;;  %v875_v15 = vrot.slane %v862_v0, 4  ;;  %v878_v46 = vsel %vm378_vm6, %v862_v0, %v877_v29 }
 0x131   : > { %v830_v5 = vpop.permute.xlu0 %829  ;;  %v3692_v52 = vperm.slane %v878_v46, %v3369_v51  ;;  %v866_v59 = vsel %vm378_vm6, %v3624_v62, %v865_v55 }
 0x132   : > { %v907_v11 = vrot.slane %v830_v5, 4  ;;  %v3643_v39 = vpop.permute.xlu2 %1239  ;;  %v826_v14 = vpop.permute.xlu1 %825  ;;  %v3652_v23 = vsel %vm378_vm6, %v863_v60, %v846_v54  ;;  %v876_v22 = vsel %vm378_vm6, %v875_v15, %v850_v10  ;;  %v910_v34 = vsel %vm378_vm6, %v830_v5, %v909_v48 }
 0x133   : > { %v895_v56 = vrot.slane %v826_v14, 4  ;;  %v898_v16 = vsel %vm378_vm6, %v826_v14, %v897_v2  ;;  %762 = vrot.lane.b32.xlu1 %v3638_v6, %s3112_s5  ;;  %v3676_v40 = vperm.slane %v876_v22, %v3369_v51  ;;  %v918_v50 = vperm.slane %v910_v34, %v3342_v30 }
 0x134   : > { %v908_v20 = vsel %vm378_vm6, %v907_v11, %v3589_v13  ;;  %v906_v31 = vperm.slane %v898_v16, %v3342_v30  ;;  %v3714_v2 = vperm.slane %v866_v59, %v3369_v51 }
 0x135   : > { %v914_v24 = vperm.slane %v908_v20, %v3342_v30  ;;  %v896_v26 = vsel %vm378_vm6, %v895_v56, %v3587_v12  ;;  %v931_v5 = vrot.slane %v918_v50, 4 }
 0x136   : > { %v902_v12 = vperm.slane %v896_v26, %v3342_v30  ;;  %v933_v43 = vrot.slane %v906_v31, 4 }
 0x137   : > { %v919_v36 = vrot.slane %v914_v24, 4  ;;  %770 = vrot.lane.b32.xlu0 %v3658_v27, %s3111_s4  ;;  %v932_v10 = vsel %vm378_vm6, %v931_v5, %v906_v31 }
 0x138   : > { %742 = vrot.lane.b32.xlu2 %v3662_v32, %s3111_s4  ;;  %v934_v53 = vsel %vm378_vm6, %v918_v50, %v933_v43  ;;  %v921_v63 = vrot.slane %v902_v12, 4  ;;  %v3722_v62 = vperm.slane %v932_v10, %v3369_v51 }
 0x139   : > { %v3673_v38 = vpop.permute.xlu0 %1241  ;;  %v3684_v4 = vsel %vm378_vm6, %v919_v36, %v902_v12  ;;  %v3703_v3 = vperm.slane %v934_v53, %v3369_v51 }
 0x13a   : > { %v3678_v13 = vpop.permute.xlu2 %1245  ;;  %v3680_v45 = vpop.permute.xlu1 %1243  ;;  %v922_v21 = vsel %vm378_vm6, %v914_v24, %v921_v63 }
 0x13b   : > { %964 = vrot.lane.b32.xlu1 %v3676_v40, %s3112_s5  ;;  %v3711_v60 = vperm.slane %v922_v21, %v3369_v51 }
 0x13f   : > { %972 = vrot.lane.b32.xlu0 %v3692_v52, %s3111_s4 }
 0x140   : > { %754 = vrot.lane.b32.xlu2 %v3695_v37, %s3110_s30 }
 0x141   : > { %v496_v57 = vpop.permute.xlu0 %495 }
 0x142   : > { %v512_v0 = vpop.permute.xlu1 %511  ;;  %v504_v47 = vpop.permute.xlu2 %503 }
 0x143   : > { %1000 = vrot.lane.b32.xlu1 %v3703_v3, %s3111_s4 }
 0x147   : > { %984 = vrot.lane.b32.xlu0 %v3711_v60, %s3110_s30 }
 0x148   : > { %956 = vrot.lane.b32.xlu2 %v3714_v2, %s3110_s30 }
 0x149   : > { %v532_v7 = vpop.permute.xlu0 %531 }
 0x14a   : > { %v524_v35 = vpop.permute.xlu1 %523  ;;  %v540_v54 = vpop.permute.xlu2 %539 }
 0x150   : > { %992 = vrot.lane.b32.xlu2 %v3722_v62, %s3112_s5 }
 0x151   : > { %v1159_v11 = vpop.permute.xlu0 %1158 }
 0x152   : > { %v1151_v14 = vpop.permute.xlu1 %1150  ;;  %v1167_v15 = vpop.permute.xlu2 %1166 }
 0x159   : > { %v1195_v56 = vpop.permute.xlu0 %1194 }
 0x15a   : > { %v1187_v16 = vpop.permute.xlu1 %1186  ;;  %v1179_v18 = vpop.permute.xlu2 %1178 }
 0x161   : > { %v508_v20 = vpop.permute.xlu0 %507 }
 0x162   : > { %v500_v24 = vpop.permute.xlu1 %499  ;;  %v492_v26 = vpop.permute.xlu2 %491 }
 0x163   : > { %v547_v29 = vsel %vm546_vm7, %v3534_v17, %v492_v26 }
 0x164   : > { %v549_v31 = vsel %vm548_vm8, %v547_v29, %v496_v57 }
 0x165   : > { %v551_v22 = vsel %vm550_vm9, %v549_v31, %v500_v24 }
 0x166   : > { %v553_v48 = vsel %vm552_vm10, %v551_v22, %v504_v47 }
 0x167   : > { %v555_v36 = vsel %vm554_vm11, %v553_v48, %v508_v20 }
 0x168   : > { %v557_v34 = vsel %vm556_vm12, %v555_v36, %v512_v0 }
 0x169   : > { %v520_v33 = vpop.permute.xlu0 %519 }
 0x16a   : > { %v536_v12 = vpop.permute.xlu1 %535  ;;  %v516_v43 = vpop.permute.xlu2 %515  ;;  %v560_v17 = vsel %vm546_vm7, %v3492_v1, %v520_v33  ;;  %v1277_v33 = vrot.slane %v3680_v45, 4 }
 0x16b   : > { %v559_v46 = vsel %vm558_vm13, %v557_v34, %v516_v43  ;;  %v561_v53 = vsel %vm548_vm8, %v560_v17, %v524_v35 }
 0x16c   : > { %567 = vst [vmem:[#allocation2 + $0xe8] sm:$0xf] %v559_v46 }
 0x171   : > { %v544_v44 = vpop.permute.xlu0 %543 }
 0x172   : > { %v1163_v50 = vpop.permute.xlu1 %1162  ;;  %v528_v63 = vpop.permute.xlu2 %527 }
 0x173   : > { %v562_v55 = vsel %vm550_vm9, %v561_v53, %v528_v63 }
 0x174   : > { %v563_v57 = vsel %vm552_vm10, %v562_v55, %v532_v7  ;;  %v1321_v55 = vrot.slane %v3673_v38, 4 }
 0x175   : > { %v564_v47 = vsel %vm554_vm11, %v563_v57, %v536_v12 }
 0x176   : > { %v565_v0 = vsel %vm556_vm12, %v564_v47, %v540_v54 }
 0x177   : > { %v566_v21 = vsel %vm558_vm13, %v565_v0, %v544_v44 }
 0x178   : > { %568 = vst [vmem:[#allocation2 + $0x10] sm:$0xf] %v566_v21 }
 0x179   : > { %v1147_v59 = vpop.permute.xlu0 %1146 }
 0x17a   : > { %v1201_v1 = vsel %vm546_vm7, %v3526_v42, %v1147_v59  ;;  %v1175_v5 = vpop.permute.xlu1 %1174  ;;  %v1155_v10 = vpop.permute.xlu2 %1154 }
 0x17b   : > { %v1202_v35 = vsel %vm548_vm8, %v1201_v1, %v1151_v14  ;;  %v1208_v42 = vsel %vm546_vm7, %v3531_v28, %v1175_v5 }
 0x17c   : > { %v1203_v20 = vsel %vm550_vm9, %v1202_v35, %v1155_v10  ;;  %v1209_v14 = vsel %vm548_vm8, %v1208_v42, %v1179_v18  ;;  %v1265_v18 = vrot.slane %v3643_v39, 4 }
 0x17d   : > { %v1204_v24 = vsel %vm552_vm10, %v1203_v20, %v1159_v11 }
 0x17e   : > { %v1205_v7 = vsel %vm554_vm11, %v1204_v24, %v1163_v50 }
 0x17f   : > { %v1206_v54 = vsel %vm556_vm12, %v1205_v7, %v1167_v15 }
 0x181   : > { %v1171_v26 = vpop.permute.xlu0 %1170 }
 0x182   : > { %v1207_v29 = vsel %vm558_vm13, %v1206_v54, %v1171_v26  ;;  %v1191_v31 = vpop.permute.xlu2 %1190  ;;  %v1250_v48 = vpop.permute.xlu1 %1249  ;;  %v1333_v54 = vrot.slane %v3678_v13, 4 }
 0x183   : > { %v1217_v22 = vrot.slane %v1207_v29, 4 }
 0x185   : > { %1221 = vst [vmem:[#allocation2 + $0x50] sm:$0xf0] %v1217_v22 }
 0x189   : > { %v1183_v36 = vpop.permute.xlu0 %1182 }
 0x18a   : > { %v1210_v11 = vsel %vm550_vm9, %v1209_v14, %v1183_v36  ;;  %v1252_v12 = vpop.permute.xlu2 %1251  ;;  %v1199_v46 = vpop.permute.xlu1 %1198 }
 0x18b   : > { %v1211_v34 = vsel %vm552_vm10, %v1210_v11, %v1187_v16  ;;  %v1278_v43 = vsel %vm378_vm6, %v1252_v12, %v1277_v33  ;;  %v1275_v53 = vrot.slane %v1252_v12, 4  ;;  %v1319_v16 = vrot.slane %v1250_v48, 4 }
 0x18c   : > { %v1212_v15 = vsel %vm554_vm11, %v1211_v34, %v1191_v31  ;;  %v1286_v50 = vperm.slane %v1278_v43, %v3342_v30  ;;  %v661_v11 = vrot.slane %v3621_v61, 4 }
 0x18d   : > { %v1213_v17 = vsel %vm556_vm12, %v1212_v15, %v1195_v56  ;;  %v1322_v56 = vsel %vm378_vm6, %v1250_v48, %v1321_v55  ;;  %v1276_v59 = vsel %vm378_vm6, %v1275_v53, %v3680_v45  ;;  %v1320_v20 = vsel %vm378_vm6, %v1319_v16, %v3673_v38 }
 0x18e   : > { %v1214_v44 = vsel %vm558_vm13, %v1213_v17, %v1199_v46  ;;  %v1299_v0 = vrot.slane %v1286_v50, 4  ;;  %v1330_v7 = vperm.slane %v1322_v56, %v3342_v30  ;;  %v3781_v26 = vperm.slane %v1276_v59, %v3342_v30 }
 0x18f   : > { %v1218_v28 = vrot.slane %v1214_v44, 4  ;;  %v3792_v38 = vperm.slane %v1320_v20, %v3342_v30  ;;  %v662_v17 = vsel %vm378_vm6, 0.0, %v661_v11  ;;  %v659_v55 = vrot.slane %v3609_v41, 4 }
 0x190   : > { %v1357_v14 = vrot.slane %v1330_v7, 4  ;;  %v3853_v41 = vperm.slane %v3652_v23, %v3369_v51  ;;  %v3871_v20 = vperm.slane %v3684_v4, %v3369_v51  ;;  %v945_v4 = vrot.slane %v3711_v60, 4 }
 0x191   : > { %1222 = vst [vmem:[#allocation2 + $0x68] sm:$0xf0] %v1218_v28  ;;  %v1248_v63 = vpop.permute.xlu0 %1247  ;;  %v1345_v34 = vrot.slane %v3792_v38, 4  ;;  %v660_v16 = vsel %vm378_vm6, 0.0, %v659_v55 }
 0x192   : > { %v1263_v57 = vrot.slane %v1248_v63, 4  ;;  %v1266_v47 = vsel %vm378_vm6, %v1248_v63, %v1265_v18  ;;  %v887_v59 = vrot.slane %v3853_v41, 4 }
 0x193   : > { %v1274_v21 = vperm.slane %v1266_v47, %v3342_v30  ;;  %v663_v47 = vrot.slane %v3662_v32, 4  ;;  %v715_v32 = vrot.slane %v3695_v37, 4  ;;  %v889_v37 = vrot.slane %v3714_v2, 4 }
 0x194   : > { %v1264_v1 = vsel %vm378_vm6, %v1263_v57, %v3643_v39  ;;  %v719_v57 = vrot.slane %v3658_v27, 4 }
 0x195   : > { %v3771_v5 = vperm.slane %v1264_v1, %v3342_v30  ;;  %v1301_v10 = vrot.slane %v1274_v21, 4  ;;  %v1300_v35 = vsel %vm378_vm6, %v1299_v0, %v1274_v21  ;;  %v717_v21 = vrot.slane %v3638_v6, 4 }
 0x196   : > { %v3777_v24 = vperm.slane %v1300_v35, %v3369_v51  ;;  %v720_v0 = vsel %vm378_vm6, 0.0, %v719_v57  ;;  %v664_v56 = vsel %vm378_vm6, 0.0, %v663_v47  ;;  %v888_v6 = vsel %vm378_vm6, 0.0, %v887_v59  ;;  %v3952_v47 = vld [vmem:[#allocation3 + $0x32] sm:$0xff]  ;;  %v3976_v59 = vld [vmem:[#allocation3 + $0x3a] sm:$0xff] }
 0x197   : > { %v1289_v45 = vrot.slane %v3771_v5, 4  ;;  %v1302_v39 = vsel %vm378_vm6, %v1286_v50, %v1301_v10  ;;  %v3829_v50 = vperm.slane %v3613_v49, %v3369_v51  ;;  %v718_v27 = vsel %vm378_vm6, 0.0, %v717_v21 }
 0x198   : > { %1388 = vrot.lane.b32.xlu1 %v3777_v24, %s3112_s5  ;;  %v3789_v29 = vperm.slane %v1302_v39, %v3369_v51  ;;  %v891_v1 = vrot.slane %v3676_v40, 4  ;;  %v716_v23 = vsel %vm378_vm6, 0.0, %v715_v32  ;;  %v893_v35 = vrot.slane %v3692_v52, 4  ;;  %v2868_v32 = vld [vmem:[#allocation3 + $0x19] sm:$0xff] }
 0x199   : > { %v1254_v31 = vpop.permute.xlu0 %1253  ;;  %v1290_v22 = vsel %vm378_vm6, %v3781_v26, %v1289_v45  ;;  %v890_v45 = vsel %vm378_vm6, 0.0, %v889_v37  ;;  %v1287_v39 = vrot.slane %v3781_v26, 4  ;;  %v2987_v37 = vld [vmem:[#allocation3 + $0x31] sm:$0xff] }
 0x19a   : > { %v1331_v48 = vrot.slane %v1254_v31, 4  ;;  %v1334_v42 = vsel %vm378_vm6, %v1254_v31, %v1333_v54  ;;  %1396 = vrot.lane.b32.xlu0 %v3789_v29, %s3111_s4  ;;  %v3800_v36 = vperm.slane %v1290_v22, %v3369_v51  ;;  %v892_v10 = vsel %vm378_vm6, 0.0, %v891_v1 }
 0x19b   : > { %v1342_v33 = vperm.slane %v1334_v42, %v3342_v30  ;;  %v894_v40 = vsel %vm378_vm6, 0.0, %v893_v35  ;;  %v1288_v2 = vsel %vm378_vm6, %v1287_v39, %v3771_v5  ;;  %v947_v54 = vrot.slane %v3722_v62, 4  ;;  %v4002_v39 = vld [vmem:[#allocation3 + $0xa] sm:$0xff] }
 0x19c   : > { %v1332_v12 = vsel %vm378_vm6, %v1331_v48, %v3678_v13  ;;  %1380 = vrot.lane.b32.xlu2 %v3800_v36, %s3110_s30  ;;  %v3821_v13 = vperm.slane %v3584_v9, %v3369_v51  ;;  %v657_v9 = vrot.slane %v3829_v50, 4  ;;  %v946_v31 = vsel %vm378_vm6, 0.0, %v945_v4  ;;  %v2867_v4 = vld [vmem:[#allocation3 + $0x9] sm:$0xff] }
 0x19d   : > { %v3810_v15 = vperm.slane %v1332_v12, %v3342_v30  ;;  %v1355_v43 = vrot.slane %v1342_v33, 4  ;;  %v3813_v46 = vsel %vm378_vm6, %v1342_v33, %v1357_v14  ;;  %v949_v22 = vrot.slane %v3703_v3, 4  ;;  %v3902_v33 = vpop.permute.xlu2 %742 }
 0x19e   : > { %v713_v53 = vrot.slane %v3821_v13, 4  ;;  %v658_v49 = vsel %vm378_vm6, 0.0, %v657_v9  ;;  %v3890_v48 = vperm.slane %v1288_v2, %v3369_v51  ;;  %v948_v26 = vsel %vm378_vm6, 0.0, %v947_v54  ;;  %v3932_v9 = vld [vmem:[#allocation3 + $0x52] sm:$0xff] }
 0x19f   : > { %v1346_v61 = vsel %vm378_vm6, %v3810_v15, %v1345_v34  ;;  %v1356_v44 = vsel %vm378_vm6, %v1355_v43, %v1330_v7  ;;  %v943_v7 = vrot.slane %v3871_v20, 4  ;;  %v950_v60 = vsel %vm378_vm6, 0.0, %v949_v22 }
 0x1a0   : > { %738 = vrot.lane.b32.xlu1 %v662_v17, %s3113_s6  ;;  %v3825_v28 = vperm.slane %v1346_v61, %v3369_v51  ;;  %v3834_v18 = vperm.slane %v1356_v44, %v3369_v51  ;;  %v714_v63 = vsel %vm378_vm6, 0.0, %v713_v53  ;;  %v1311_v42 = vrot.slane %v3890_v48, 4  ;;  %v3928_v53 = vld [vmem:[#allocation3 + $0x4a] sm:$0xff] }
 0x1a1   : > { %v944_v52 = vsel %vm378_vm6, 0.0, %v943_v7  ;;  %v1343_v5 = vrot.slane %v3810_v15, 4  ;;  %v1313_v62 = vrot.slane %v3800_v36, 4  ;;  %v1315_v14 = vrot.slane %v3777_v24, 4  ;;  %v3998_v7 = vld [vmem:[#allocation3 + $0x2] sm:$0xff] }
 0x1a2   : > { %1408 = vrot.lane.b32.xlu0 %v3825_v28, %s3110_s30  ;;  %v1312_v3 = vsel %vm378_vm6, 0.0, %v1311_v42  ;;  %v1317_v15 = vrot.slane %v3789_v29, 4  ;;  %v1371_v24 = vrot.slane %v3834_v18, 4  ;;  %v1369_v44 = vrot.slane %v3825_v28, 4  ;;  %v735_v28 = vpop.permute.xlu0 %734 }
 0x1a3   : > { %v1344_v11 = vsel %vm378_vm6, %v1343_v5, %v3792_v38  ;;  %v1314_v12 = vsel %vm378_vm6, 0.0, %v1313_v62  ;;  %v1316_v34 = vsel %vm378_vm6, 0.0, %v1315_v14 }
 0x1a4   : > { %1416 = vrot.lane.b32.xlu2 %v3834_v18, %s3112_s5  ;;  %v3912_v36 = vperm.slane %v1344_v11, %v3369_v51  ;;  %v1318_v43 = vsel %vm378_vm6, 0.0, %v1317_v15  ;;  %v1372_v38 = vsel %vm378_vm6, 0.0, %v1371_v24  ;;  %v1370_v18 = vsel %vm378_vm6, 0.0, %v1369_v44 }
 0x1a5   : > { %v3920_v61 = vpop.permute.xlu2 %754 }
 0x1a6   : > { %v1367_v17 = vrot.slane %v3912_v36, 4 }
 0x1a8   : > { %750 = vrot.lane.b32.xlu1 %v714_v63, %s3115_s8  ;;  %v1368_v29 = vsel %vm378_vm6, 0.0, %v1367_v17  ;;  %v727_v63 = vpop.permute.xlu1 %726 }
 0x1aa   : > { %722 = vrot.lane.b32.xlu0 %v658_v49, %s3115_s8  ;;  %v3948_v57 = vpop.permute.xlu0 %770 }
 0x1ac   : > { %730 = vrot.lane.b32.xlu2 %v660_v16, %s3114_s7 }
 0x1ad   : > { %v3934_v55 = vpop.permute.xlu2 %956 }
 0x1b0   : > { %774 = vrot.lane.b32.xlu1 %v720_v0, %s3116_s9  ;;  %v3944_v49 = vpop.permute.xlu1 %762  ;;  %v3956_v0 = vld [vmem:[#allocation3 + $0x22] sm:$0xff] }
 0x1b2   : > { %746 = vrot.lane.b32.xlu0 %v664_v56, %s3116_s9  ;;  %v3968_v56 = vpop.permute.xlu0 %972 }
 0x1b4   : > { %766 = vrot.lane.b32.xlu2 %v718_v27, %s3113_s6 }
 0x1b5   : > { %v3946_v16 = vpop.permute.xlu2 %992 }
 0x1b8   : > { %952 = vrot.lane.b32.xlu1 %v888_v6, %s3115_s8  ;;  %v3964_v21 = vpop.permute.xlu1 %964 }
 0x1ba   : > { %758 = vrot.lane.b32.xlu0 %v716_v23, %s3114_s7  ;;  %v3983_v1 = vpop.permute.xlu0 %984 }
 0x1bc   : > { %968 = vrot.lane.b32.xlu2 %v892_v10, %s3113_s6 }
 0x1c0   : > { %976 = vrot.lane.b32.xlu1 %v894_v40, %s3116_s9  ;;  %v3980_v6 = vpop.permute.xlu1 %1000 }
 0x1c2   : > { %960 = vrot.lane.b32.xlu0 %v890_v45, %s3114_s7 }
 0x1c4   : > { %980 = vrot.lane.b32.xlu2 %v944_v52, %s3115_s8 }
 0x1c8   : > { %988 = vrot.lane.b32.xlu1 %v946_v31, %s3114_s7 }
 0x1ca   : > { %996 = vrot.lane.b32.xlu0 %v948_v26, %s3113_s6 }
 0x1cc   : > { %1004 = vrot.lane.b32.xlu2 %v950_v60, %s3116_s9 }
 0x1d0   : > { %1376 = vrot.lane.b32.xlu1 %v1312_v3, %s3115_s8 }
 0x1d2   : > { %1384 = vrot.lane.b32.xlu0 %v1314_v12, %s3114_s7 }
 0x1d4   : > { %1392 = vrot.lane.b32.xlu2 %v1316_v34, %s3113_s6 }
 0x1d8   : > { %1400 = vrot.lane.b32.xlu1 %v1318_v43, %s3116_s9 }
 0x1da   : > { %1420 = vrot.lane.b32.xlu0 %v1372_v38, %s3113_s6 }
 0x1dc   : > { %1404 = vrot.lane.b32.xlu2 %v1368_v29, %s3115_s8 }
 0x1e0   : > { %1412 = vrot.lane.b32.xlu1 %v1370_v18, %s3114_s7 }
 0x1e2   : > { %2129 = vrot.lane.b32.xlu0 %v3928_v53, %s3107_s28 }
 0x1e4   : > { %1901 = vrot.lane.b32.xlu2 %v3932_v9, %s3106_s24 }
 0x1e8   : > { %1899 = vrot.lane.b32.xlu1 %v3928_v53, %s3106_s24 }
 0x1ea   : > { %1477 = vrot.lane.b32.xlu0 %v3425_v19, %s3107_s28  ;;  %v3962_v19 = vld [vmem:[#allocation3 + $0x1a] sm:$0xff] }
 0x1ec   : > { %1475 = vrot.lane.b32.xlu2 %v3382_v58, %s3107_s28 }
 0x1f0   : > { %2131 = vrot.lane.b32.xlu1 %v3932_v9, %s3107_s28 }
 0x1f2   : > { %1895 = vrot.lane.b32.xlu0 %v3952_v47, %s3106_s24 }
 0x1f4   : > { %1893 = vrot.lane.b32.xlu2 %v3956_v0, %s3106_s24 }
 0x1f6   : > { %v3960_v58 = vpop.permute.xlu2 %1380 }
 0x1f8   : > { %1891 = vrot.lane.b32.xlu1 %v3962_v19, %s3106_s24 }
 0x1fa   : > { %2123 = vrot.lane.b32.xlu0 %v3956_v0, %s3107_s28 }
 0x1fc   : > { %2121 = vrot.lane.b32.xlu2 %v3962_v19, %s3107_s28 }
 0x1fe   : > { %v3974_v27 = vpop.permute.xlu2 %1416 }
 0x200   : > { %1897 = vrot.lane.b32.xlu1 %v3976_v59, %s3106_s24 }
 0x202   : > { %1467 = vrot.lane.b32.xlu0 %v2868_v32, %s3107_s28 }
 0x204   : > { %2127 = vrot.lane.b32.xlu2 %v3976_v59, %s3107_s28 }
 0x206   : > { %v731_v23 = vpop.permute.xlu2 %730 }
 0x208   : > { %2125 = vrot.lane.b32.xlu1 %v3952_v47, %s3107_s28 }
 0x20a   : > { %v3989_v10 = vpop.permute.xlu1 %1388  ;;  %1473 = vrot.lane.b32.xlu0 %v3441_v25, %s3107_s28 }
 0x20c   : > { %v3993_v35 = vpop.permute.xlu0 %1396  ;;  %1471 = vrot.lane.b32.xlu2 %v2987_v37, %s3107_s28 }
 0x20e   : > { %v767_v40 = vpop.permute.xlu2 %766 }
 0x210   : > { %1469 = vrot.lane.b32.xlu1 %v3407_v8, %s3107_s28  ;;  %v2866_v8 = vld [vmem:[#allocation3 + $0x1] sm:$0xff] }
 0x212   : > { %v739_v45 = vpop.permute.xlu1 %738  ;;  %2117 = vrot.lane.b32.xlu0 %v3998_v7, %s3107_s28 }
 0x214   : > { %v1409_v52 = vpop.permute.xlu0 %1408  ;;  %1889 = vrot.lane.b32.xlu2 %v4002_v39, %s3106_s24 }
 0x216   : > { %v969_v25 = vpop.permute.xlu2 %968 }
 0x218   : > { %1887 = vrot.lane.b32.xlu1 %v3998_v7, %s3106_s24 }
 0x21a   : > { %v751_v2 = vpop.permute.xlu1 %750  ;;  %1465 = vrot.lane.b32.xlu0 %v2867_v4, %s3107_s28 }
 0x21b   : > { %v784_v34 = vsel %vm546_vm7, %v3821_v13, %v751_v2 }
 0x21c   : > { %v723_v54 = vpop.permute.xlu0 %722  ;;  %1463 = vrot.lane.b32.xlu2 %v2866_v8, %s3107_s28  ;;  %v785_v43 = vsel %vm548_vm8, %v784_v34, %v3920_v61 }
 0x21d   : > { %v777_v31 = vsel %vm546_vm7, %v3829_v50, %v723_v54 }
 0x21e   : > { %v778_v22 = vsel %vm548_vm8, %v777_v31, %v727_v63  ;;  %v981_v26 = vpop.permute.xlu2 %980 }
 0x21f   : > { %v779_v60 = vsel %vm550_vm9, %v778_v22, %v731_v23 }
 0x220   : > { %2119 = vrot.lane.b32.xlu1 %v4002_v39, %s3107_s28  ;;  %v780_v42 = vsel %vm552_vm10, %v779_v60, %v735_v28  ;;  %s2704_s28 = scalar_lea.hbm %s4758_s3, %s2904_s22 }
 0x221   : > { %v781_v5 = vsel %vm554_vm11, %v780_v42, %v739_v45 }
 0x222   : > { %v775_v62 = vpop.permute.xlu1 %774  ;;  %v782_v14 = vsel %vm556_vm12, %v781_v5, %v3902_v33 }
 0x224   : > { %v747_v3 = vpop.permute.xlu0 %746 }
 0x225   : > { %v783_v11 = vsel %vm558_vm13, %v782_v14, %v747_v3 }
 0x226   : > { %v793_v50 = vrot.slane %v783_v11, 4  ;;  %v1005_v12 = vpop.permute.xlu2 %1004 }
 0x228   : > { %797 = vst [vmem:[#allocation2 + $0xe8] sm:$0xf0] %v793_v50 }
 0x22a   : > { %v953_v15 = vpop.permute.xlu1 %952 }
 0x22b   : > { %v1007_v18 = vsel %vm546_vm7, %v3853_v41, %v953_v15 }
 0x22c   : > { %v759_v24 = vpop.permute.xlu0 %758  ;;  %v1008_v32 = vsel %vm548_vm8, %v1007_v18, %v3934_v55 }
 0x22d   : > { %v786_v17 = vsel %vm550_vm9, %v785_v43, %v759_v24 }
 0x22e   : > { %v787_v38 = vsel %vm552_vm10, %v786_v17, %v3944_v49  ;;  %v1393_v29 = vpop.permute.xlu2 %1392 }
 0x22f   : > { %v788_v33 = vsel %vm554_vm11, %v787_v38, %v767_v40 }
 0x230   : > { %v789_v44 = vsel %vm556_vm12, %v788_v33, %v3948_v57  ;;  %v1014_v57 = vsel %vm546_vm7, %v3871_v20, %v981_v26 }
 0x231   : > { %v790_v13 = vsel %vm558_vm13, %v789_v44, %v775_v62 }
 0x232   : > { %v794_v63 = vrot.slane %v790_v13, 4  ;;  %v977_v28 = vpop.permute.xlu1 %976 }
 0x234   : > { %798 = vst [vmem:[#allocation2 + $0x10] sm:$0xf0] %v794_v63  ;;  %v961_v61 = vpop.permute.xlu0 %960 }
 0x235   : > { %v1009_v49 = vsel %vm550_vm9, %v1008_v32, %v961_v61 }
 0x236   : > { %v1010_v23 = vsel %vm552_vm10, %v1009_v49, %v3964_v21  ;;  %v1405_v37 = vpop.permute.xlu2 %1404  ;;  %v1015_v21 = vsel %vm548_vm8, %v1014_v57, %v3983_v1 }
 0x237   : > { %v1011_v41 = vsel %vm554_vm11, %v1010_v23, %v969_v25  ;;  %v1438_v40 = vsel %vm546_vm7, %v3912_v36, %v1405_v37 }
 0x238   : > { %v1012_v45 = vsel %vm556_vm12, %v1011_v41, %v3968_v56  ;;  %v1439_v4 = vsel %vm548_vm8, %v1438_v40, %v1409_v52 }
 0x239   : > { %v1013_v55 = vsel %vm558_vm13, %v1012_v45, %v977_v28 }
 0x23a   : > { %1021 = vst [vmem:[#allocation2 + $0x50] sm:$0xf] %v1013_v55  ;;  %v989_v2 = vpop.permute.xlu1 %988 }
 0x23b   : > { %v1016_v8 = vsel %vm550_vm9, %v1015_v21, %v989_v2 }
 0x23c   : > { %v997_v20 = vpop.permute.xlu0 %996  ;;  %v1017_v25 = vsel %vm552_vm10, %v1016_v8, %v3946_v16 }
 0x23d   : > { %v1018_v36 = vsel %vm554_vm11, %v1017_v25, %v997_v20 }
 0x23e   : > { %v1019_v56 = vsel %vm556_vm12, %v1018_v36, %v3980_v6  ;;  %v1902_v54 = vpop.permute.xlu2 %1901 }
 0x23f   : > { %v1020_v52 = vsel %vm558_vm13, %v1019_v56, %v1005_v12  ;;  %v1979_v32 = vrot.slane %v1902_v54, 4 }
 0x240   : > { %1022 = vst [vmem:[#allocation2 + $0x68] sm:$0xf] %v1020_v52 }
 0x242   : > { %v1377_v31 = vpop.permute.xlu1 %1376 }
 0x243   : > { %v1431_v22 = vsel %vm546_vm7, %v3890_v48, %v1377_v31 }
 0x244   : > { %v1385_v1 = vpop.permute.xlu0 %1384  ;;  %v1432_v26 = vsel %vm548_vm8, %v1431_v22, %v3960_v58 }
 0x245   : > { %v1433_v60 = vsel %vm550_vm9, %v1432_v26, %v1385_v1 }
 0x246   : > { %v1434_v16 = vsel %vm552_vm10, %v1433_v60, %v3989_v10  ;;  %v4064_v42 = vpop.permute.xlu2 %1475 }
 0x247   : > { %v1435_v6 = vsel %vm554_vm11, %v1434_v16, %v1393_v29 }
 0x248   : > { %v1436_v62 = vsel %vm556_vm12, %v1435_v6, %v3993_v35 }
 0x24a   : > { %v1401_v5 = vpop.permute.xlu1 %1400 }
 0x24b   : > { %v1437_v3 = vsel %vm558_vm13, %v1436_v62, %v1401_v5 }
 0x24c   : > { %1445 = vst [vmem:[#allocation2 + $0xe0] sm:$0xf] %v1437_v3  ;;  %v1421_v48 = vpop.permute.xlu0 %1420 }
 0x24e   : > { %v1894_v14 = vpop.permute.xlu2 %1893 }
 0x24f   : > { %v1981_v11 = vrot.slane %v1894_v14, 4  ;;  %v1980_v37 = vsel %vm378_vm6, %v1979_v32, %v1894_v14 }
 0x250   : > { %v4107_v45 = vperm.slane %v1980_v37, %v3342_v30  ;;  %v1699_v37 = vrot.slane %v3928_v53, 4 }
 0x251   : > { %v1982_v58 = vsel %vm378_vm6, %v1902_v54, %v1981_v11  ;;  %v1755_v11 = vrot.slane %v3932_v9, 4 }
 0x252   : > { %v1413_v50 = vpop.permute.xlu1 %1412  ;;  %v1990_v57 = vperm.slane %v1982_v58, %v3342_v30  ;;  %v1991_v31 = vrot.slane %v4107_v45, 4 }
 0x253   : > { %v1440_v12 = vsel %vm550_vm9, %v1439_v4, %v1413_v50  ;;  %v1756_v32 = vsel %vm378_vm6, %v1755_v11, %v3956_v0 }
 0x254   : > { %v1441_v10 = vsel %vm552_vm10, %v1440_v12, %v3974_v27  ;;  %v2130_v34 = vpop.permute.xlu0 %2129  ;;  %v2003_v2 = vrot.slane %v1990_v57, 4 }
 0x255   : > { %v4075_v43 = vsel %vm554_vm11, %v1441_v10, %v1421_v48  ;;  %v2153_v14 = vrot.slane %v2130_v34, 4 }
 0x256   : > { %v2122_v15 = vpop.permute.xlu2 %2121 }
 0x257   : > { %v2155_v24 = vrot.slane %v2122_v15, 4 }
 0x259   : > { %v2156_v35 = vsel %vm378_vm6, %v2130_v34, %v2155_v24  ;;  %v1687_v34 = vrot.slane %v3952_v47, 4 }
 0x25a   : > { %v4078_v17 = vpop.permute.xlu1 %1899 }
 0x25c   : > { %v4080_v38 = vpop.permute.xlu0 %1477 }
 0x25e   : > { %v4082_v29 = vpop.permute.xlu2 %2127 }
 0x262   : > { %v4084_v33 = vpop.permute.xlu1 %2131 }
 0x264   : > { %v4086_v44 = vpop.permute.xlu0 %1895 }
 0x266   : > { %v4088_v18 = vpop.permute.xlu2 %1471 }
 0x26a   : > { %v4090_v27 = vpop.permute.xlu1 %1891 }
 0x26b   : > { %v1925_v13 = vrot.slane %v4090_v27, 4 }
 0x26c   : > { %v4093_v63 = vpop.permute.xlu0 %2123 }
 0x26d   : > { %v4097_v28 = vsel %vm378_vm6, %v4078_v17, %v1925_v13  ;;  %v2211_v61 = vrot.slane %v4093_v63, 4  ;;  %v1743_v13 = vrot.slane %v3976_v59, 4 }
 0x26e   : > { %v1890_v49 = vpop.permute.xlu2 %1889 }
 0x26f   : > { %v4102_v23 = vsel %vm378_vm6, %v4084_v33, %v2211_v61  ;;  %v1969_v41 = vrot.slane %v1890_v49, 4  ;;  %v2154_v61 = vsel %vm378_vm6, %v2153_v14, %v2122_v15  ;;  %v1744_v15 = vsel %vm378_vm6, %v1743_v13, %v4002_v39 }
 0x270   : > { %v1911_v13 = vrot.slane %v4086_v44, 4 }
 0x272   : > { %v1898_v40 = vpop.permute.xlu1 %1897 }
 0x273   : > { %v1967_v4 = vrot.slane %v1898_v40, 4  ;;  %v1970_v55 = vsel %vm378_vm6, %v1898_v40, %v1969_v41  ;;  %v4157_v41 = vperm.slane %v2154_v61, %v3342_v30  ;;  %v1487_v61 = vrot.slane %v4088_v18, 4 }
 0x274   : > { %v1978_v21 = vperm.slane %v1970_v55, %v3342_v30  ;;  %v1468_v8 = vpop.permute.xlu0 %1467  ;;  %v2164_v55 = vperm.slane %v2156_v35, %v3342_v30 }
 0x275   : > { %v1968_v20 = vsel %vm378_vm6, %v1967_v4, %v1890_v49  ;;  %v1501_v25 = vrot.slane %v1468_v8, 4  ;;  %v4164_v4 = vperm.slane %v1756_v32, %v3342_v30 }
 0x276   : > { %v4113_v36 = vperm.slane %v1968_v20, %v3342_v30  ;;  %v2005_v56 = vrot.slane %v1978_v21, 4  ;;  %v4115_v54 = vpop.permute.xlu2 %1463  ;;  %v4118_v52 = vsel %vm378_vm6, %v2003_v2, %v1978_v21  ;;  %v1923_v2 = vrot.slane %v4078_v17, 4 }
 0x277   : > { %v1502_v22 = vsel %vm378_vm6, %v4064_v42, %v1501_v25  ;;  %v1489_v1 = vrot.slane %v4115_v54, 4  ;;  %v1499_v25 = vrot.slane %v4064_v42, 4  ;;  %v1767_v11 = vrot.slane %v4164_v4, 4 }
 0x278   : > { %v1510_v26 = vperm.slane %v1502_v22, %v3342_v30  ;;  %v1992_v16 = vsel %vm378_vm6, %v1991_v31, %v4113_v36  ;;  %v4130_v6 = vsel %vm378_vm6, %v1990_v57, %v2005_v56  ;;  %v1688_v57 = vsel %vm378_vm6, %v1687_v34, %v3998_v7 }
 0x279   : > { %v1490_v60 = vsel %vm378_vm6, %v4088_v18, %v1489_v1  ;;  %v4134_v48 = vperm.slane %v1992_v16, %v3369_v51  ;;  %v4171_v31 = vperm.slane %v1688_v57, %v3342_v30  ;;  %v1700_v22 = vsel %vm378_vm6, %v1699_v37, %v3962_v19 }
 0x27a   : > { %v1523_v5 = vrot.slane %v1510_v26, 4  ;;  %v1498_v62 = vperm.slane %v1490_v60, %v3342_v30  ;;  %v2126_v3 = vpop.permute.xlu1 %2125  ;;  %v1924_v1 = vsel %vm378_vm6, %v1923_v2, %v4090_v27  ;;  %v2165_v60 = vrot.slane %v4157_v41, 4 }
 0x27b   : > { %v2015_v12 = vrot.slane %v4134_v48, 4  ;;  %v2141_v21 = vrot.slane %v2126_v3, 4  ;;  %v1500_v42 = vsel %vm378_vm6, %v1499_v25, %v1468_v8  ;;  %v4190_v27 = vperm.slane %v1700_v22, %v3342_v30 }
 0x27c   : > { %v1525_v58 = vrot.slane %v1498_v62, 4  ;;  %v4137_v50 = vpop.permute.xlu0 %1473  ;;  %v4141_v10 = vsel %vm378_vm6, %v1523_v5, %v1498_v62  ;;  %v4186_v5 = vperm.slane %v1744_v15, %v3342_v30  ;;  %v2177_v62 = vrot.slane %v2164_v55, 4 }
 0x27d   : > { %v2016_v24 = vsel %vm378_vm6, 0.0, %v2015_v12  ;;  %v1930_v12 = vperm.slane %v1924_v1, %v3342_v30  ;;  %v1488_v18 = vsel %vm378_vm6, %v1487_v61, %v4115_v54 }
 0x27e   : > { %2052 = vrot.lane.b32.xlu2 %v2016_v24, %s3115_s8  ;;  %v4151_v49 = vsel %vm378_vm6, %v1510_v26, %v1525_v58  ;;  %v2209_v58 = vrot.slane %v4084_v33, 4  ;;  %v4208_v33 = vperm.slane %v4097_v28, %v3342_v30  ;;  %v1993_v28 = vrot.slane %v4113_v36, 4 }
 0x27f   : > { %v1935_v25 = vrot.slane %v1930_v12, 4 }
 0x280   : > { %v2210_v32 = vsel %vm378_vm6, %v2209_v58, %v4093_v63 }
 0x282   : > { %v4159_v40 = vpop.permute.xlu1 %1469 }
 0x283   : > { %v1557_v20 = vrot.slane %v4159_v40, 4 }
 0x284   : > { %v2118_v56 = vpop.permute.xlu0 %2117 }
 0x285   : > { %v1558_v35 = vsel %vm378_vm6, %v4080_v38, %v1557_v20  ;;  %v2142_v17 = vsel %vm378_vm6, %v2141_v21, %v2118_v56  ;;  %v2143_v26 = vrot.slane %v2118_v56, 4 }
 0x286   : > { %v4183_v16 = vperm.slane %v2142_v17, %v3342_v30 }
 0x287   : > { %v2144_v14 = vsel %vm378_vm6, %v2126_v3, %v2143_v26  ;;  %v4201_v3 = vperm.slane %v1500_v42, %v3342_v30 }
 0x288   : > { %v2152_v8 = vperm.slane %v2144_v14, %v3342_v30  ;;  %v2166_v24 = vsel %vm378_vm6, %v2165_v60, %v4183_v16  ;;  %v4229_v60 = vperm.slane %v1488_v18, %v3342_v30  ;;  %v1566_v14 = vperm.slane %v1558_v35, %v3342_v30 }
 0x289   : > { %v4204_v34 = vperm.slane %v2166_v24, %v3369_v51  ;;  %v1511_v1 = vrot.slane %v4201_v3, 4  ;;  %v2216_v24 = vperm.slane %v2210_v32, %v3342_v30  ;;  %v1994_v18 = vsel %vm378_vm6, %v4107_v45, %v1993_v28 }
 0x28a   : > { %v2179_v37 = vrot.slane %v2152_v8, 4  ;;  %v1888_v57 = vpop.permute.xlu1 %1887  ;;  %v4213_v15 = vsel %vm378_vm6, %v2177_v62, %v2152_v8  ;;  %v1947_v8 = vrot.slane %v4208_v33, 4  ;;  %v1711_v32 = vrot.slane %v4190_v27, 4 }
 0x28b   : > { %v1912_v2 = vsel %vm378_vm6, %v1911_v13, %v1888_v57  ;;  %v1913_v21 = vrot.slane %v1888_v57, 4  ;;  %v2189_v20 = vrot.slane %v4204_v34, 4  ;;  %v2220_v13 = vperm.slane %v4102_v23, %v3342_v30 }
 0x28c   : > { %v1918_v56 = vperm.slane %v1912_v2, %v3342_v30  ;;  %v1466_v22 = vpop.permute.xlu0 %1465  ;;  %v4222_v63 = vsel %vm378_vm6, %v2164_v55, %v2179_v37  ;;  %v2197_v55 = vrot.slane %v4082_v29, 4  ;;  %v1768_v23 = vsel %vm378_vm6, %v1767_v11, %v4186_v5 }
 0x28d   : > { %v1914_v17 = vsel %vm378_vm6, %v4086_v44, %v1913_v21  ;;  %v1545_v54 = vrot.slane %v1466_v22, 4  ;;  %v2190_v26 = vsel %vm378_vm6, 0.0, %v2189_v20  ;;  %v1512_v21 = vsel %vm378_vm6, %v1511_v1, %v4229_v60 }
 0x28e   : > { %v1922_v42 = vperm.slane %v1914_v17, %v3342_v30  ;;  %v1937_v36 = vrot.slane %v1918_v56, 4  ;;  %2254 = vrot.lane.b32.xlu0 %v2190_v26, %s3115_s8  ;;  %v1936_v62 = vsel %vm378_vm6, %v1935_v25, %v1918_v56  ;;  %v1579_v20 = vrot.slane %v1566_v14, 4 }
 0x28f   : > { %v1546_v44 = vsel %vm378_vm6, %v4137_v50, %v1545_v54  ;;  %v4239_v58 = vperm.slane %v1936_v62, %v3369_v51  ;;  %v1555_v28 = vrot.slane %v4080_v38, 4  ;;  %v2221_v1 = vrot.slane %v2216_v24, 4 }
 0x290   : > { %v1938_v61 = vsel %vm378_vm6, %v1930_v12, %v1937_v36  ;;  %v1554_v37 = vperm.slane %v1546_v44, %v3342_v30  ;;  %v4259_v12 = vsel %vm378_vm6, %v1947_v8, %v1922_v42  ;;  %v2002_v11 = vperm.slane %v1994_v18, %v3369_v51 }
 0x291   : > { %v4248_v57 = vperm.slane %v1938_v61, %v3369_v51  ;;  %v1959_v35 = vrot.slane %v4239_v58, 4  ;;  %v2233_v54 = vrot.slane %v2220_v13, 4  ;;  %v4272_v36 = vperm.slane %v1512_v21, %v3369_v51 }
 0x292   : > { %v2120_v2 = vpop.permute.xlu1 %2119  ;;  %v4275_v62 = vsel %vm378_vm6, %v1579_v20, %v1554_v37  ;;  %v1543_v61 = vrot.slane %v4137_v50, 4  ;;  %v1712_v18 = vsel %vm378_vm6, %v1711_v32, %v4171_v31 }
 0x293   : > { %v2198_v25 = vsel %vm378_vm6, %v2197_v55, %v2120_v2  ;;  %v2199_v56 = vrot.slane %v2120_v2, 4  ;;  %2028 = vrot.lane.b32.xlu2 %v4248_v57, %s3110_s30  ;;  %v1960_v45 = vsel %vm378_vm6, 0.0, %v1959_v35  ;;  %v1949_v55 = vrot.slane %v1922_v42, 4 }
 0x294   : > { %v2204_v17 = vperm.slane %v2198_v25, %v3342_v30  ;;  %2024 = vrot.lane.b32.xlu1 %v1960_v45, %s3115_s8  ;;  %v1556_v35 = vsel %vm378_vm6, %v1555_v28, %v4159_v40  ;;  %v1581_v2 = vrot.slane %v1554_v37, 4  ;;  %v1544_v25 = vsel %vm378_vm6, %v1543_v61, %v1466_v22 }
 0x295   : > { %v2200_v26 = vsel %vm378_vm6, %v4082_v29, %v2199_v56  ;;  %v1535_v40 = vrot.slane %v4272_v36, 4  ;;  %v1562_v45 = vperm.slane %v1556_v35, %v3342_v30  ;;  %v4298_v28 = vperm.slane %v1712_v18, %v3369_v51 }
 0x296   : > { %v2208_v38 = vperm.slane %v2200_v26, %v3342_v30  ;;  %v2223_v44 = vrot.slane %v2204_v17, 4  ;;  %2056 = vrot.lane.b32.xlu0 %v2002_v11, %s3110_s30  ;;  %v2222_v8 = vsel %vm378_vm6, %v2221_v1, %v2204_v17  ;;  %v4302_v37 = vsel %vm378_vm6, %v4208_v33, %v1949_v55 }
 0x297   : > { %v4284_v29 = vperm.slane %v2222_v8, %v3369_v51  ;;  %v2167_v22 = vrot.slane %v4183_v16, 4  ;;  %v1550_v1 = vperm.slane %v1544_v25, %v3342_v30  ;;  %v4313_v17 = vsel %vm378_vm6, %v1566_v14, %v1581_v2 }
 0x298   : > { %v2235_v42 = vrot.slane %v2208_v38, 4  ;;  %v2224_v21 = vsel %vm378_vm6, %v2216_v24, %v2223_v44  ;;  %v4290_v20 = vsel %vm378_vm6, %v2233_v54, %v2208_v38  ;;  %v1536_v54 = vsel %vm378_vm6, 0.0, %v1535_v40 }
 0x299   : > { %v2232_v50 = vperm.slane %v2224_v21, %v3369_v51  ;;  %v2245_v56 = vrot.slane %v4284_v29, 4  ;;  %v4317_v33 = vperm.slane %v1768_v23, %v3369_v51  ;;  %v1735_v16 = vrot.slane %v4298_v28, 4 }
 0x29a   : > { %v4305_v24 = vsel %vm378_vm6, %v2220_v13, %v2235_v42  ;;  %v1567_v13 = vrot.slane %v1562_v45, 4  ;;  %v2168_v26 = vsel %vm378_vm6, %v4157_v41, %v2167_v22  ;;  %v2017_v41 = vrot.slane %v2002_v11, 4 }
 0x29b   : > { %2286 = vrot.lane.b32.xlu2 %v2232_v50, %s3110_s30  ;;  %v2246_v32 = vsel %vm378_vm6, 0.0, %v2245_v56  ;;  %v1791_v38 = vrot.slane %v4317_v33, 4  ;;  %v1736_v14 = vsel %vm378_vm6, 0.0, %v1735_v16  ;;  %v2176_v44 = vperm.slane %v2168_v26, %v3369_v51 }
 0x29c   : > { %2282 = vrot.lane.b32.xlu1 %v2246_v32, %s3115_s8  ;;  %v1568_v55 = vsel %vm378_vm6, %v1567_v13, %v1550_v1  ;;  %v1513_v18 = vrot.slane %v4229_v60, 4  ;;  %v2018_v2 = vsel %vm378_vm6, 0.0, %v2017_v41  ;;  %v1569_v21 = vrot.slane %v1550_v1, 4 }
 0x29d   : > { %v4329_v23 = vperm.slane %v1568_v55, %v3369_v51  ;;  %v1792_v8 = vsel %vm378_vm6, 0.0, %v1791_v38  ;;  %v2191_v35 = vrot.slane %v2176_v44, 4  ;;  %v1961_v56 = vrot.slane %v4248_v57, 4 }
 0x29e   : > { %1600 = vrot.lane.b32.xlu0 %v1536_v54, %s3115_s8  ;;  %v1514_v11 = vsel %vm378_vm6, %v4201_v3, %v1513_v18  ;;  %v1570_v40 = vsel %vm378_vm6, %v1562_v45, %v1569_v21  ;;  %v1769_v1 = vrot.slane %v4186_v5, 4  ;;  %v2247_v57 = vrot.slane %v2232_v50, 4 }
 0x29f   : > { %v1591_v61 = vrot.slane %v4329_v23, 4  ;;  %v2192_v25 = vsel %vm378_vm6, 0.0, %v2191_v35  ;;  %v1522_v60 = vperm.slane %v1514_v11, %v3369_v51  ;;  %v1962_v22 = vsel %vm378_vm6, 0.0, %v1961_v56 }
 0x2a0   : > { %v1578_v32 = vperm.slane %v1570_v40, %v3369_v51  ;;  %v1770_v3 = vsel %vm378_vm6, %v4164_v4, %v1769_v1  ;;  %v2248_v45 = vsel %vm378_vm6, 0.0, %v2247_v57  ;;  %v1954_v13 = vperm.slane %v4259_v12, %v3369_v51 }
 0x2a1   : > { %v1592_v42 = vsel %vm378_vm6, 0.0, %v1591_v61  ;;  %v1778_v54 = vperm.slane %v1770_v3, %v3369_v51  ;;  %v1713_v16 = vrot.slane %v4171_v31, 4  ;;  %v2184_v4 = vperm.slane %v4213_v15, %v3369_v51 }
 0x2a2   : > { %v2240_v26 = vperm.slane %v4290_v20, %v3369_v51  ;;  %v1593_v31 = vrot.slane %v1578_v32, 4  ;;  %v1963_v38 = vrot.slane %v1954_v13, 4  ;;  %v1701_v20 = vrot.slane %v3962_v19, 4 }
 0x2a3   : > { %1800 = vrot.lane.b32.xlu2 %v1736_v14, %s3115_s8  ;;  %v1714_v5 = vsel %vm378_vm6, %v4190_v27, %v1713_v16  ;;  %v2010_v27 = vperm.slane %v4118_v52, %v3369_v51  ;;  %v1537_v14 = vrot.slane %v1522_v60, 4  ;;  %v1689_v35 = vrot.slane %v3998_v7, 4 }
 0x2a4   : > { %2258 = vrot.lane.b32.xlu1 %v2176_v44, %s3110_s30  ;;  %v1722_v50 = vperm.slane %v1714_v5, %v3369_v51  ;;  %v1594_v55 = vsel %vm378_vm6, 0.0, %v1593_v31  ;;  %v1964_v41 = vsel %vm378_vm6, 0.0, %v1963_v38  ;;  %v1702_v61 = vsel %vm378_vm6, %v3928_v53, %v1701_v20 }
 0x2a5   : > { %v2019_v44 = vrot.slane %v2010_v27, 4  ;;  %v1538_v52 = vsel %vm378_vm6, 0.0, %v1537_v14  ;;  %v2249_v19 = vrot.slane %v2240_v26, 4  ;;  %v1745_v21 = vrot.slane %v4002_v39, 4 }
 0x2a6   : > { %1828 = vrot.lane.b32.xlu0 %v1792_v8, %s3115_s8  ;;  %v1737_v12 = vrot.slane %v1722_v50, 4  ;;  %v1757_v8 = vrot.slane %v3956_v0, 4  ;;  %v4392_v0 = vperm.slane %v1702_v61, %v3342_v30  ;;  %v1690_v53 = vsel %vm378_vm6, %v3952_v47, %v1689_v35 }
 0x2a7   : > { %v2020_v18 = vsel %vm378_vm6, 0.0, %v2019_v44  ;;  %v2250_v7 = vsel %vm378_vm6, 0.0, %v2249_v19  ;;  %v1698_v39 = vperm.slane %v1690_v53, %v3342_v30  ;;  %v1746_v47 = vsel %vm378_vm6, %v3976_v59, %v1745_v21 }
 0x2a8   : > { %v1738_v15 = vsel %vm378_vm6, 0.0, %v1737_v12  ;;  %v1723_v11 = vrot.slane %v4392_v0, 4  ;;  %v1590_v53 = vperm.slane %v4313_v17, %v3369_v51 }
 0x2aa   : > { %v1724_v40 = vsel %vm378_vm6, %v1723_v11, %v1698_v39  ;;  %v1534_v11 = vperm.slane %v4151_v49, %v3369_v51 }
 0x2ab   : > { %2060 = vrot.lane.b32.xlu2 %v2018_v2, %s3114_s7  ;;  %v1758_v2 = vsel %vm378_vm6, %v3932_v9, %v1757_v8  ;;  %v1530_v9 = vperm.slane %v4141_v10, %v3369_v51  ;;  %v1730_v1 = vperm.slane %v1724_v40, %v3369_v51 }
 0x2ac   : > { %1628 = vrot.lane.b32.xlu1 %v1592_v42, %s3115_s8  ;;  %v1793_v42 = vrot.slane %v1778_v54, 4 }
 0x2ad   : > { %v1539_v5 = vrot.slane %v1530_v9, 4  ;;  %v1739_v38 = vrot.slane %v1730_v1, 4 }
 0x2ae   : > { %2262 = vrot.lane.b32.xlu0 %v2192_v25, %s3114_s7  ;;  %v4400_v25 = vperm.slane %v1758_v2, %v3342_v30  ;;  %v1794_v56 = vsel %vm378_vm6, 0.0, %v1793_v42 }
 0x2b3   : > { %1604 = vrot.lane.b32.xlu2 %v1522_v60, %s3110_s30  ;;  %v1779_v60 = vrot.slane %v4400_v25, 4 }
 0x2b4   : > { %2032 = vrot.lane.b32.xlu1 %v1962_v22, %s3114_s7  ;;  %v2193_v22 = vrot.slane %v2184_v4, 4 }
 0x2b6   : > { %1632 = vrot.lane.b32.xlu0 %v1578_v32, %s3110_s30  ;;  %v4416_v32 = vperm.slane %v1746_v47, %v3342_v30  ;;  %v2194_v3 = vsel %vm378_vm6, 0.0, %v2193_v22 }
 0x2b8   : > { %v1780_v10 = vsel %vm378_vm6, %v1779_v60, %v4416_v32  ;;  %v1781_v17 = vrot.slane %v4416_v32, 4 }
 0x2b9   : > { %v1786_v59 = vperm.slane %v1780_v10, %v3369_v51 }
 0x2ba   : > { %v1782_v47 = vsel %vm378_vm6, %v4400_v25, %v1781_v17 }
 0x2bb   : > { %1832 = vrot.lane.b32.xlu2 %v1778_v54, %s3110_s30  ;;  %v2014_v54 = vperm.slane %v4130_v6, %v3369_v51  ;;  %v1958_v6 = vperm.slane %v4302_v37, %v3369_v51  ;;  %v1790_v32 = vperm.slane %v1782_v47, %v3369_v51 }
 0x2bc   : > { %2290 = vrot.lane.b32.xlu1 %v2248_v45, %s3114_s7  ;;  %v1586_v45 = vperm.slane %v4275_v62, %v3369_v51 }
 0x2bd   : > { %v1965_v31 = vrot.slane %v1958_v6, 4  ;;  %v2021_v35 = vrot.slane %v2014_v54, 4 }
 0x2be   : > { %2036 = vrot.lane.b32.xlu0 %v1954_v13, %s3112_s5  ;;  %v2188_v13 = vperm.slane %v4222_v63, %v3369_v51  ;;  %v1795_v63 = vrot.slane %v1786_v59, 4 }
 0x2c0   : > { %v1796_v12 = vsel %vm378_vm6, 0.0, %v1795_v63 }
 0x2c3   : > { %2266 = vrot.lane.b32.xlu2 %v2184_v4, %s3112_s5  ;;  %v1595_v4 = vrot.slane %v1586_v45, 4 }
 0x2c4   : > { %1804 = vrot.lane.b32.xlu1 %v1722_v50, %s3110_s30  ;;  %v1540_v50 = vsel %vm378_vm6, 0.0, %v1539_v5  ;;  %v1366_v5 = vperm.slane %v3813_v46, %v3369_v51 }
 0x2c6   : > { %2294 = vrot.lane.b32.xlu0 %v2240_v26, %s3112_s5  ;;  %v1596_v26 = vsel %vm378_vm6, 0.0, %v1595_v4 }
 0x2cb   : > { %1636 = vrot.lane.b32.xlu2 %v1594_v55, %s3114_s7  ;;  %v2244_v55 = vperm.slane %v4305_v24, %v3369_v51  ;;  %v1740_v24 = vsel %vm378_vm6, 0.0, %v1739_v38 }
 0x2cc   : > { %2064 = vrot.lane.b32.xlu1 %v2010_v27, %s3112_s5  ;;  %v1966_v27 = vsel %vm378_vm6, 0.0, %v1965_v31 }
 0x2cd   : > { %v2251_v20 = vrot.slane %v2244_v55, 4 }
 0x2ce   : > { %1808 = vrot.lane.b32.xlu0 %v1738_v15, %s3114_s7  ;;  %v2195_v15 = vrot.slane %v2188_v13, 4 }
 0x2d0   : > { %v2196_v44 = vsel %vm378_vm6, 0.0, %v2195_v15 }
 0x2d3   : > { %2040 = vrot.lane.b32.xlu2 %v1964_v41, %s3113_s6  ;;  %v2252_v41 = vsel %vm378_vm6, 0.0, %v2251_v20 }
 0x2d4   : > { %1608 = vrot.lane.b32.xlu1 %v1538_v52, %s3114_s7 }
 0x2d6   : > { %2068 = vrot.lane.b32.xlu0 %v2020_v18, %s3113_s6  ;;  %v1725_v18 = vrot.slane %v1698_v39, 4 }
 0x2d8   : > { %v2053_v57 = vpop.permute.xlu2 %2052 }
 0x2d9   : > { %v2086_v19 = vsel %vm546_vm7, %v4134_v48, %v2053_v57 }
 0x2db   : > { %2298 = vrot.lane.b32.xlu2 %v2250_v7, %s3113_s6  ;;  %v1726_v7 = vsel %vm378_vm6, %v4392_v0, %v1725_v18  ;;  %v1541_v0 = vrot.slane %v1534_v11, 4 }
 0x2dc   : > { %1836 = vrot.lane.b32.xlu1 %v1794_v56, %s3114_s7  ;;  %v1734_v48 = vperm.slane %v1726_v7, %v3369_v51 }
 0x2dd   : > { %v1542_v10 = vsel %vm378_vm6, 0.0, %v1541_v0 }
 0x2de   : > { %1612 = vrot.lane.b32.xlu0 %v1530_v9, %s3112_s5 }
 0x2e3   : > { %1812 = vrot.lane.b32.xlu2 %v1730_v1, %s3112_s5  ;;  %v1597_v1 = vrot.slane %v1590_v53, 4 }
 0x2e4   : > { %2270 = vrot.lane.b32.xlu1 %v2194_v3, %s3113_s6 }
 0x2e5   : > { %v1598_v25 = vsel %vm378_vm6, 0.0, %v1597_v1 }
 0x2e6   : > { %1840 = vrot.lane.b32.xlu0 %v1786_v59, %s3112_s5 }
 0x2eb   : > { %2072 = vrot.lane.b32.xlu2 %v2014_v54, %s3111_s4 }
 0x2ec   : > { %1640 = vrot.lane.b32.xlu1 %v1586_v45, %s3112_s5 }
 0x2ed   : > { %v2029_v16 = vpop.permute.xlu2 %2028 }
 0x2ee   : > { %2274 = vrot.lane.b32.xlu0 %v2188_v13, %s3111_s4 }
 0x2f3   : > { %1616 = vrot.lane.b32.xlu2 %v1540_v50, %s3113_s6 }
 0x2f4   : > { %2044 = vrot.lane.b32.xlu1 %v1958_v6, %s3111_s4  ;;  %v1741_v6 = vrot.slane %v1734_v48, 4 }
 0x2f5   : > { %v2287_v62 = vpop.permute.xlu2 %2286 }
 0x2f6   : > { %1644 = vrot.lane.b32.xlu0 %v1596_v26, %s3113_s6 }
 0x2fb   : > { %1844 = vrot.lane.b32.xlu2 %v1796_v12, %s3113_s6  ;;  %v1373_v12 = vrot.slane %v1366_v5, 4 }
 0x2fc   : > { %2302 = vrot.lane.b32.xlu1 %v2244_v55, %s3111_s4 }
 0x2fd   : > { %v4447_v37 = vpop.permute.xlu2 %1800  ;;  %v1374_v15 = vsel %vm378_vm6, 0.0, %v1373_v12 }
 0x2fe   : > { %2048 = vrot.lane.b32.xlu0 %v1966_v27, %s3116_s9 }
 0x300   : > { %v2255_v14 = vpop.permute.xlu0 %2254 }
 0x301   : > { %v2309_v59 = vsel %vm546_vm7, %v4204_v34, %v2255_v14 }
 0x303   : > { %2278 = vrot.lane.b32.xlu2 %v2196_v44, %s3116_s9 }
 0x304   : > { %1816 = vrot.lane.b32.xlu1 %v1740_v24, %s3113_s6 }
 0x305   : > { %v2061_v8 = vpop.permute.xlu2 %2060 }
 0x306   : > { %v2025_v52 = vpop.permute.xlu1 %2024  ;;  %2306 = vrot.lane.b32.xlu0 %v2252_v41, %s3116_s9 }
 0x307   : > { %v2079_v61 = vsel %vm546_vm7, %v4239_v58, %v2025_v52  ;;  %v2022_v58 = vsel %vm378_vm6, 0.0, %v2021_v35 }
 0x308   : > { %v2057_v2 = vpop.permute.xlu0 %2056  ;;  %v2080_v42 = vsel %vm548_vm8, %v2079_v61, %v2029_v16 }
 0x309   : > { %v2087_v21 = vsel %vm548_vm8, %v2086_v19, %v2057_v2 }
 0x30a   : > { %v4474_v56 = vsel %vm550_vm9, %v2087_v21, %v2061_v8 }
 0x30b   : > { %1648 = vrot.lane.b32.xlu2 %v1590_v53, %s3111_s4 }
 0x30c   : > { %2076 = vrot.lane.b32.xlu1 %v2022_v58, %s3116_s9 }
 0x30d   : > { %v1605_v9 = vpop.permute.xlu2 %1604 }
 0x30e   : > { %v2283_v39 = vpop.permute.xlu1 %2282  ;;  %1820 = vrot.lane.b32.xlu0 %v1734_v48, %s3111_s4 }
 0x30f   : > { %v2316_v49 = vsel %vm546_vm7, %v4284_v29, %v2283_v39 }
 0x310   : > { %v1601_v60 = vpop.permute.xlu0 %1600  ;;  %v2317_v40 = vsel %vm548_vm8, %v2316_v49, %v2287_v62 }
 0x311   : > { %v1655_v22 = vsel %vm546_vm7, %v4272_v36, %v1601_v60  ;;  %v1797_v36 = vrot.slane %v1790_v32, 4 }
 0x312   : > { %v4490_v29 = vsel %vm548_vm8, %v1655_v22, %v1605_v9 }
 0x313   : > { %1624 = vrot.lane.b32.xlu2 %v1542_v10, %s3116_s9  ;;  %v1798_v16 = vsel %vm378_vm6, 0.0, %v1797_v36 }
 0x314   : > { %1620 = vrot.lane.b32.xlu1 %v1534_v11, %s3111_s4 }
 0x315   : > { %v1833_v3 = vpop.permute.xlu2 %1832 }
 0x316   : > { %v2259_v57 = vpop.permute.xlu1 %2258  ;;  %1652 = vrot.lane.b32.xlu0 %v1598_v25, %s3116_s9 }
 0x317   : > { %v2310_v54 = vsel %vm548_vm8, %v2309_v59, %v2259_v57 }
 0x318   : > { %v1829_v45 = vpop.permute.xlu0 %1828 }
 0x319   : > { %v1862_v13 = vsel %vm546_vm7, %v4317_v33, %v1829_v45  ;;  %v1742_v33 = vsel %vm378_vm6, 0.0, %v1741_v6 }
 0x31a   : > { %v4505_v34 = vsel %vm548_vm8, %v1862_v13, %v1833_v3 }
 0x31b   : > { %1852 = vrot.lane.b32.xlu2 %v1798_v16, %s3116_s9 }
 0x31c   : > { %1848 = vrot.lane.b32.xlu1 %v1790_v32, %s3111_s4 }
 0x31d   : > { %v2267_v4 = vpop.permute.xlu2 %2266 }
 0x31e   : > { %v1629_v50 = vpop.permute.xlu1 %1628  ;;  %1424 = vrot.lane.b32.xlu0 %v1366_v5, %s3111_s4 }
 0x31f   : > { %v1662_v46 = vsel %vm546_vm7, %v4329_v23, %v1629_v50  ;;  %v1855_v23 = vsel %vm546_vm7, %v4298_v28, %v4447_v37 }
 0x320   : > { %v2263_v62 = vpop.permute.xlu0 %2262 }
 0x321   : > { %v2311_v17 = vsel %vm550_vm9, %v2310_v54, %v2263_v62 }
 0x322   : > { %v2312_v0 = vsel %vm552_vm10, %v2311_v17, %v2267_v4 }
 0x324   : > { %1824 = vrot.lane.b32.xlu1 %v1742_v33, %s3116_s9 }
 0x325   : > { %v1637_v26 = vpop.permute.xlu2 %1636 }
 0x326   : > { %v2033_v63 = vpop.permute.xlu1 %2032 }
 0x327   : > { %v2081_v31 = vsel %vm550_vm9, %v2080_v42, %v2033_v63 }
 0x328   : > { %v1633_v55 = vpop.permute.xlu0 %1632 }
 0x329   : > { %v1663_v27 = vsel %vm548_vm8, %v1662_v46, %v1633_v55 }
 0x32a   : > { %v4517_v38 = vsel %vm550_vm9, %v1663_v27, %v1637_v26 }
 0x32c   : > { %1428 = vrot.lane.b32.xlu1 %v1374_v15, %s3116_s9 }
 0x32d   : > { %v2041_v14 = vpop.permute.xlu2 %2040 }
 0x32e   : > { %v2291_v20 = vpop.permute.xlu1 %2290 }
 0x32f   : > { %v2318_v44 = vsel %vm550_vm9, %v2317_v40, %v2291_v20 }
 0x330   : > { %v2037_v24 = vpop.permute.xlu0 %2036 }
 0x331   : > { %v2082_v3 = vsel %vm552_vm10, %v2081_v31, %v2037_v24 }
 0x332   : > { %v2083_v59 = vsel %vm554_vm11, %v2082_v3, %v2041_v14 }
 0x335   : > { %v2299_v8 = vpop.permute.xlu2 %2298 }
 0x336   : > { %v1805_v41 = vpop.permute.xlu1 %1804 }
 0x337   : > { %v1856_v52 = vsel %vm548_vm8, %v1855_v23, %v1805_v41 }
 0x338   : > { %v2295_v61 = vpop.permute.xlu0 %2294 }
 0x339   : > { %v2319_v13 = vsel %vm552_vm10, %v2318_v44, %v2295_v61 }
 0x33a   : > { %v2320_v5 = vsel %vm554_vm11, %v2319_v13, %v2299_v8 }
 0x33d   : > { %v1813_v35 = vpop.permute.xlu2 %1812 }
 0x33e   : > { %v2065_v18 = vpop.permute.xlu1 %2064 }
 0x33f   : > { %v2089_v62 = vsel %vm552_vm10, %v4474_v56, %v2065_v18 }
 0x340   : > { %v1809_v19 = vpop.permute.xlu0 %1808 }
 0x341   : > { %v1857_v2 = vsel %vm550_vm9, %v1856_v52, %v1809_v19 }
 0x342   : > { %v4526_v42 = vsel %vm552_vm10, %v1857_v2, %v1813_v35  ;;  %v2358_v2 = vld [vmem:[%s4757_s2] sm:$0xff] }
 0x345   : > { %v2073_v21 = vpop.permute.xlu2 %2072 }
 0x346   : > { %v1609_v53 = vpop.permute.xlu1 %1608 }
 0x347   : > { %v1657_v15 = vsel %vm550_vm9, %v4490_v29, %v1609_v53 }
 0x348   : > { %v2069_v7 = vpop.permute.xlu0 %2068 }
 0x349   : > { %v2090_v33 = vsel %vm554_vm11, %v2089_v62, %v2069_v7  ;;  %v3117_v7 = vmov 0  }
 0x34a   : > { %v2091_v31 = vsel %vm556_vm12, %v2090_v33, %v2073_v21  ;;  %2985 = vset.pattern.permute.xlu2 %v3117_v7  ;;  %2986 = vset.pattern.permute.xlu0 %v3117_v7 }
 0x34b   : > { %2361 = vperm.xlu2 %2985, %v2358_v2  }
 0x34d   : > { %v1617_v11 = vpop.permute.xlu2 %1616 }
 0x34e   : > { %v1837_v58 = vpop.permute.xlu1 %1836 }
 0x34f   : > { %v1864_v18 = vsel %vm550_vm9, %v4505_v34, %v1837_v58 }
 0x350   : > { %v1613_v48 = vpop.permute.xlu0 %1612 }
 0x351   : > { %v1658_v14 = vsel %vm552_vm10, %v1657_v15, %v1613_v48 }
 0x352   : > { %v1659_v8 = vsel %vm554_vm11, %v1658_v14, %v1617_v11 }
 0x355   : > { %v1845_v28 = vpop.permute.xlu2 %1844 }
 0x356   : > { %v2271_v9 = vpop.permute.xlu1 %2270 }
 0x357   : > { %v2313_v49 = vsel %vm554_vm11, %v2312_v0, %v2271_v9 }
 0x358   : > { %v1841_v37 = vpop.permute.xlu0 %1840 }
 0x359   : > { %v1865_v19 = vsel %vm552_vm10, %v1864_v18, %v1841_v37 }
 0x35a   : > { %v1866_v53 = vsel %vm554_vm11, %v1865_v19, %v1845_v28 }
 0x35d   : > { %v2279_v60 = vpop.permute.xlu2 %2278 }
 0x35e   : > { %v1641_v39 = vpop.permute.xlu1 %1640 }
 0x35f   : > { %v1665_v56 = vsel %vm552_vm10, %v4517_v38, %v1641_v39 }
 0x360   : > { %v2275_v47 = vpop.permute.xlu0 %2274 }
 0x361   : > { %v2314_v40 = vsel %vm556_vm12, %v2313_v49, %v2275_v47 }
 0x362   : > { %v2315_v22 = vsel %vm558_vm13, %v2314_v40, %v2279_v60 }
 0x363   : > { %2323 = vst [vmem:[#allocation2 + $0xf0] sm:$0xf] %v2315_v22  ;;  %v2357_v22 = vld [vmem:[%s4756_s1] sm:$0xff] }
 0x365   : > { %v1649_v26 = vpop.permute.xlu2 %1648 }
 0x366   : > { %v2045_v1 = vpop.permute.xlu1 %2044 }
 0x367   : > { %v2084_v57 = vsel %vm556_vm12, %v2083_v59, %v2045_v1  ;;  %v2325_v1 = vld [vmem:[#allocation2 + $0xe8] sm:$0xff] }
 0x368   : > { %v1645_v10 = vpop.permute.xlu0 %1644 }
 0x369   : > { %v1666_v20 = vsel %vm554_vm11, %v1665_v56, %v1645_v10 }
 0x36a   : > { %v2333_v32 = vld [vmem:[#allocation2 + $0xf0] sm:$0xff]  ;;  %v1667_v29 = vsel %vm556_vm12, %v1666_v20, %v1649_v26 }
 0x36b   : > { %2375 = vmatpush.msra.mxu0 %v2333_v32  ;;  %v2326_v32 = vld [vmem:[#allocation2 + $0x10] sm:$0xff] }
 0x36d   : > { %v1625_v44 = vpop.permute.xlu2 %1624 }
 0x36e   : > { %v2303_v25 = vpop.permute.xlu1 %2302 }
 0x36f   : > { %v2321_v4 = vsel %vm556_vm12, %v2320_v5, %v2303_v25 }
 0x370   : > { %v2049_v36 = vpop.permute.xlu0 %2048 }
 0x371   : > { %v2085_v54 = vsel %vm558_vm13, %v2084_v57, %v2049_v36 }
 0x372   : > { %v2095_v45 = vrot.slane %v2085_v54, 4 }
 0x374   : > { %2099 = vst [vmem:[#allocation2 + $0x60] sm:$0xf0] %v2095_v45 }
 0x375   : > { %v1853_v11 = vpop.permute.xlu2 %1852 }
 0x376   : > { %v1817_v16 = vpop.permute.xlu1 %1816 }
 0x377   : > { %v1859_v58 = vsel %vm554_vm11, %v4526_v42, %v1817_v16  ;;  %v2327_v42 = vld [vmem:[#allocation2 + $0x50] sm:$0xff] }
 0x378   : > { %v2307_v50 = vpop.permute.xlu0 %2306 }
 0x379   : > { %v2322_v6 = vsel %vm558_vm13, %v2321_v4, %v2307_v50 }
 0x37a   : > { %2324 = vst [vmem:[#allocation2 + $0x40] sm:$0xf] %v2322_v6 }
 0x37e   : > { %v2077_v63 = vpop.permute.xlu1 %2076 }
 0x37f   : > { %v2092_v12 = vsel %vm558_vm13, %v2091_v31, %v2077_v63 }
 0x380   : > { %v2096_v46 = vrot.slane %v2092_v12, 4  ;;  %v1821_v55 = vpop.permute.xlu0 %1820 }
 0x381   : > { %v2334_v27 = vld [vmem:[#allocation2 + $0x40] sm:$0xff]  ;;  %v1860_v9 = vsel %vm556_vm12, %v1859_v58, %v1821_v55 }
 0x382   : > { %2100 = vst [vmem:[#allocation2 + $0xd8] sm:$0xf0] %v2096_v46  ;;  %2395 = vmatpush.msra.mxu1 %v2334_v27 }
 0x386   : > { %v1621_v24 = vpop.permute.xlu1 %1620 }
 0x387   : > { %v1660_v23 = vsel %vm556_vm12, %v1659_v8, %v1621_v24 }
 0x388   : > { %v1661_v41 = vsel %vm558_vm13, %v1660_v23, %v1625_v44  ;;  %v1653_v52 = vpop.permute.xlu0 %1652 }
 0x389   : > { %v1671_v61 = vrot.slane %v1661_v41, 4  ;;  %v1668_v35 = vsel %vm558_vm13, %v1667_v29, %v1653_v52 }
 0x38a   : > { %v1672_v38 = vrot.slane %v1668_v35, 4 }
 0x38b   : > { %1675 = vst [vmem:[#allocation2 + $0xe0] sm:$0xf0] %v1671_v61 }
 0x38c   : > { %1676 = vst [vmem:[#allocation2 + $0x38] sm:$0xf0] %v1672_v38 }
 0x38e   : > { %v1849_v21 = vpop.permute.xlu1 %1848 }
 0x38f   : > { %v1867_v48 = vsel %vm556_vm12, %v1866_v53, %v1849_v21 }
 0x390   : > { %v1868_v34 = vsel %vm558_vm13, %v1867_v48, %v1853_v11  ;;  %v1425_v39 = vpop.permute.xlu0 %1424 }
 0x391   : > { %1870 = vst [vmem:[#allocation2 + $0xd8] sm:$0xf] %v1868_v34  ;;  %v1443_v0 = vsel %vm556_vm12, %v4075_v43, %v1425_v39  ;;  %v2328_v43 = vld [vmem:[#allocation2 + $0x68] sm:$0xff] }
 0x392   : > { %v2329_v40 = vld [vmem:[#allocation2 + $0xe0] sm:$0xff] }
 0x396   : > { %v1825_v37 = vpop.permute.xlu1 %1824 }
 0x397   : > { %v1861_v17 = vsel %vm558_vm13, %v1860_v9, %v1825_v37 }
 0x398   : > { %1869 = vst [vmem:[#allocation2 + $0x60] sm:$0xf] %v1861_v17  ;;  %v2332_v28 = vld [vmem:[#allocation2 + $0xd8] sm:$0xff] }
 0x399   : > { %2396 = vmatpush.msra.mxu1 %v2332_v28 }
 0x39e   : > { %v1429_v49 = vpop.permute.xlu1 %1428 }
 0x39f   : > { %v1444_v47 = vsel %vm558_vm13, %v1443_v0, %v1429_v49  ;;  %v2331_v60 = vld [vmem:[#allocation2 + $0x60] sm:$0xff] }
 0x3a0   : > { %1446 = vst [vmem:[#allocation2 + $0x38] sm:$0xf] %v1444_v47  ;;  %2376 = vmatpush.msra.mxu0 %v2331_v60 }
 0x3a2   : > { %2377 = vmatpush.msra.mxu0 %v2329_v40 }
 0x3a4   : > { %2378 = vmatpush.msra.mxu0 %v2327_v42 }
 0x3a5   : > { %v2362_v3 = vpop.permute.xlu2 %2361 }
 0x3a6   : > { %2379 = vmatpush.msra.mxu0 %v2325_v1 }
 0x3a7   : > { %2380 = vmatmul.f32.vlgmr.msra.gmra.mxu0 %v2357_v22  ;;  %v2330_v10 = vld [vmem:[#allocation2 + $0x38] sm:$0xff] }
 0x3a8   : > { %2397 = vmatpush.msra.mxu1 %v2330_v10 }
 0x3aa   : > { %2398 = vmatpush.msra.mxu1 %v2328_v43 }
 0x3ac   : > { %2399 = vmatpush.msra.mxu1 %v2326_v32 }
 0x3ad   : > { %2400 = vmatmul.f32.vlgmr.msra.gmra.mxu1 %v2357_v22 }
 0x424   : > { %v2381_v25 = vpop.f32.mrf.mxu0 }
 0x425   : > { %v2382_v59 = vadd.f32 %v2381_v25, %v2362_v3 }
 0x427   : > { %2411 = vrot.lane.b32.xlu2 %v2382_v59, %s3113_s6  ;;  %2408 = vrot.lane.b32.xlu1 %v2382_v59, %s3111_s4  ;;  %v2450_v5 = vrot.slane %v2382_v59, 4 }
 0x428   : > { %2405 = vrot.lane.b32.xlu0 %v2382_v59, %s3116_s9 }
 0x42a   : > { %v2401_v57 = vpop.f32.mrf.mxu1 }
 0x42b   : > { %v4582_v36 = vadd.f32 %v2401_v57, %v2362_v3 }
 0x42d   : > { %v2562_v40 = vrot.slane %v4582_v36, 4 }
 0x42f   : > { %2420 = vrot.lane.b32.xlu2 %v2382_v59, %s3110_s30  ;;  %2417 = vrot.lane.b32.xlu1 %v2382_v59, %s3114_s7 }
 0x430   : > { %2414 = vrot.lane.b32.xlu0 %v2382_v59, %s3112_s5 }
 0x437   : > { %2430 = vrot.lane.b32.xlu2 %v4582_v36, %s3111_s4  ;;  %2427 = vrot.lane.b32.xlu1 %v4582_v36, %s3116_s9  ;;  %s2707_s4 = sshll.u32 %s2704_s28, 4  ;;  %s2708_s4 = int_to_ptr.hbm [resolvable:$true] %s2707_s4 }
 0x438   : > { %2423 = vrot.lane.b32.xlu0 %v2382_v59, %s3115_s8 }
 0x43f   : > { %2439 = vrot.lane.b32.xlu2 %v4582_v36, %s3114_s7  ;;  %2436 = vrot.lane.b32.xlu1 %v4582_v36, %s3112_s5  ;;  %s2689_s5 = scalar_lea.sflag [#allocation6], %s3214_s19 }
 0x440   : > { %2433 = vrot.lane.b32.xlu0 %v4582_v36, %s3113_s6  ;;  %s3032_s6 = sshra.s32 %s2708_s4, 4  ;;  %s3033_s6 = int_to_ptr.hbm [resolvable:$true] %s3032_s6 }
 0x441   : > { %s3034_s7 = scalar_lea.hbm %s3033_s6, 128  ;;  %p3039_p7 = scmp.lt.s32.totalorder %s3033_s6, %s4758_s3 }
 0x442   : > { %p3035_p4 = scmp.ne.s32.totalorder %s3033_s6, %s3034_s7  ;;  %p3040_p8 = scmp.lt.s32.totalorder %s3038_s10, %s3034_s7 }
 0x444   : > { %p3036_p5 = pnand %p3035_p4, %p3191_p9  ;;  %p3041_p10 = por %p3040_p8, %p3039_p7 }
 0x446   : > { %p3037_p6 = pneg %p3036_p5 }
 0x447   : > { %2445 = vrot.lane.b32.xlu1 %v4582_v36, %s3115_s8 }
 0x448   : > { %2442 = vrot.lane.b32.xlu0 %v4582_v36, %s3110_s30  ;;  %s2705_s30 = sshll.u32 %s4635_s29, 4  ;;  %p3042_p13 = pnand %p3041_p10, %p3037_p6  ;;  %s2706_s30 = int_to_ptr.vmem [resolvable:$true] %s2705_s30 }
 0x481   : > { %v2412_v54 = vpop.permute.xlu2 %2411 }
 0x482   : > { %v2460_v50 = vrot.slane %v2412_v54, 4 }
 0x489   : > { %v2421_v62 = vpop.permute.xlu2 %2420 }
 0x48a   : > { %v2472_v20 = vrot.slane %v2421_v62, 4 }
 0x491   : > { %v2431_v52 = vpop.permute.xlu2 %2430 }
 0x492   : > { %v2560_v7 = vrot.slane %v2431_v52, 4 }
 0x494   : > { %v2561_v42 = vsel %vm378_vm6, %v2560_v7, %v4582_v36 }
 0x499   : > { %v2409_v45 = vpop.permute.xlu1 %2408 }
 0x49a   : > { %v2406_v13 = vpop.permute.xlu0 %2405  ;;  %v2448_v16 = vrot.slane %v2409_v45, 4  ;;  %v2451_v6 = vsel %vm378_vm6, %v2409_v45, %v2450_v5 }
 0x49b   : > { %v2462_v4 = vrot.slane %v2406_v13, 4  ;;  %v2461_v33 = vsel %vm378_vm6, %v2460_v50, %v2406_v13  ;;  %v2459_v31 = vperm.slane %v2451_v6, %v3342_v30 }
 0x49c   : > { %v2449_v26 = vsel %vm378_vm6, %v2448_v16, %v2382_v59  ;;  %v2467_v12 = vperm.slane %v2461_v33, %v3342_v30 }
 0x49d   : > { %v2463_v63 = vsel %vm378_vm6, %v2412_v54, %v2462_v4  ;;  %v2455_v55 = vperm.slane %v2449_v26, %v3342_v30  ;;  %v2510_v14 = vrot.slane %v2459_v31, 4 }
 0x49e   : > { %v2471_v27 = vperm.slane %v2463_v63, %v3342_v30  ;;  %v2496_v44 = vrot.slane %v2467_v12, 4 }
 0x49f   : > { %v2498_v24 = vrot.slane %v2455_v55, 4 }
 0x4a0   : > { %v2508_v8 = vrot.slane %v2471_v27, 4  ;;  %v2511_v29 = vsel %vm378_vm6, %v2471_v27, %v2510_v14  ;;  %v2497_v35 = vsel %vm378_vm6, %v2496_v44, %v2455_v55  ;;  %v2567_v14 = vperm.slane %v2561_v42, %v3342_v30 }
 0x4a1   : > { %v2418_v46 = vpop.permute.xlu1 %2417  ;;  %v2499_v19 = vsel %vm378_vm6, %v2467_v12, %v2498_v24  ;;  %v2519_v11 = vperm.slane %v2511_v29, %v3369_v51  ;;  %v2503_v58 = vperm.slane %v2497_v35, %v3369_v51  ;;  %v2563_v12 = vsel %vm378_vm6, %v2431_v52, %v2562_v40 }
 0x4a2   : > { %v2415_v15 = vpop.permute.xlu0 %2414  ;;  %v2486_v18 = vrot.slane %v2418_v46, 4  ;;  %v2509_v2 = vsel %vm378_vm6, %v2508_v8, %v2459_v31  ;;  %v2507_v17 = vperm.slane %v2499_v19, %v3369_v51 }
 0x4a3   : > { %v2474_v56 = vrot.slane %v2415_v15, 4  ;;  %v2473_v41 = vsel %vm378_vm6, %v2472_v20, %v2415_v15  ;;  %v2515_v28 = vperm.slane %v2509_v2, %v3369_v51  ;;  %v2558_v22 = vrot.slane %v2519_v11, 4 }
 0x4a4   : > { %v2479_v21 = vperm.slane %v2473_v41, %v3342_v30  ;;  %v2546_v10 = vrot.slane %v2503_v58, 4  ;;  %v2550_v25 = vrot.slane %v2507_v17, 4  ;;  %v2571_v41 = vperm.slane %v2563_v12, %v3342_v30 }
 0x4a5   : > { %v2475_v23 = vsel %vm378_vm6, %v2421_v62, %v2474_v56  ;;  %v2554_v13 = vrot.slane %v2515_v28, 4 }
 0x4a6   : > { %v2483_v61 = vperm.slane %v2475_v23, %v3342_v30  ;;  %v2522_v0 = vrot.slane %v2479_v21, 4 }
 0x4a8   : > { %v2534_v9 = vrot.slane %v2483_v61, 4 }
 0x4a9   : > { %v2428_v38 = vpop.permute.xlu1 %2427 }
 0x4aa   : > { %v2424_v53 = vpop.permute.xlu0 %2423  ;;  %v2574_v16 = vrot.slane %v2428_v38, 4 }
 0x4ab   : > { %v2484_v48 = vrot.slane %v2424_v53, 4  ;;  %v2487_v34 = vsel %vm378_vm6, %v2424_v53, %v2486_v18  ;;  %v2610_v18 = vrot.slane %v2567_v14, 4 }
 0x4ac   : > { %v2495_v37 = vperm.slane %v2487_v34, %v3342_v30 }
 0x4ad   : > { %v2485_v39 = vsel %vm378_vm6, %v2484_v48, %v2418_v46  ;;  %v2440_v46 = vpop.permute.xlu2 %2439  ;;  %v2622_v48 = vrot.slane %v2571_v41, 4 }
 0x4ae   : > { %v2491_v49 = vperm.slane %v2485_v39, %v3342_v30  ;;  %v2532_v47 = vrot.slane %v2495_v37, 4  ;;  %v2535_v60 = vsel %vm378_vm6, %v2495_v37, %v2534_v9  ;;  %v2598_v52 = vrot.slane %v2440_v46, 4 }
 0x4af   : > { %v2543_v1 = vperm.slane %v2535_v60, %v3369_v51 }
 0x4b0   : > { %v2520_v43 = vrot.slane %v2491_v49, 4  ;;  %v2523_v32 = vsel %vm378_vm6, %v2491_v49, %v2522_v0  ;;  %v2533_v3 = vsel %vm378_vm6, %v2532_v47, %v2483_v61 }
 0x4b1   : > { %v2531_v59 = vperm.slane %v2523_v32, %v3369_v51  ;;  %v2539_v57 = vperm.slane %v2533_v3, %v3369_v51  ;;  %v2559_v54 = vsel %vm378_vm6, %v2543_v1, %v2558_v22  ;;  %v2437_v45 = vpop.permute.xlu1 %2436  ;;  %v2556_v5 = vrot.slane %v2543_v1, 4 }
 0x4b2   : > { %v2521_v36 = vsel %vm378_vm6, %v2520_v43, %v2479_v21  ;;  %2686 = vst.msk [vmem:[%s4635_s29 + $0x70] sm:$0xff] %vm546_vm7, %v2559_v54  ;;  %v2434_v4 = vpop.permute.xlu0 %2433  ;;  %v2586_v53 = vrot.slane %v2437_v45, 4 }
 0x4b3   : > { %v2527_v50 = vperm.slane %v2521_v36, %v3369_v51  ;;  %v2548_v6 = vrot.slane %v2531_v59, 4  ;;  %v2551_v62 = vsel %vm378_vm6, %v2531_v59, %v2550_v25  ;;  %v2552_v33 = vrot.slane %v2539_v57, 4 }
 0x4b4   : > { %v2555_v26 = vsel %vm378_vm6, %v2539_v57, %v2554_v13  ;;  %2678 = vst.msk [vmem:[%s4635_s29 + $0x30] sm:$0xff] %vm546_vm7, %v2551_v62  ;;  %v2572_v63 = vrot.slane %v2434_v4, 4  ;;  %v2575_v31 = vsel %vm378_vm6, %v2434_v4, %v2574_v16  ;;  %v2557_v8 = vsel %vm378_vm6, %v2556_v5, %v2519_v11 }
 0x4b5   : > { %v2544_v55 = vrot.slane %v2527_v50, 4  ;;  %v2547_v27 = vsel %vm378_vm6, %v2527_v50, %v2546_v10  ;;  %v2549_v15 = vsel %vm378_vm6, %v2548_v6, %v2507_v17  ;;  %2682 = vst.msk [vmem:[%s4635_s29 + $0x50] sm:$0xff] %vm546_vm7, %v2555_v26  ;;  %v2553_v56 = vsel %vm378_vm6, %v2552_v33, %v2515_v28 }
 0x4b6   : > { %2674 = vst.msk [vmem:[%s4635_s29 + $0x10] sm:$0xff] %vm546_vm7, %v2547_v27  ;;  %v2573_v20 = vsel %vm378_vm6, %v2572_v63, %v2428_v38  ;;  %v2583_v44 = vperm.slane %v2575_v31, %v3342_v30 }
 0x4b7   : > { %v2545_v24 = vsel %vm378_vm6, %v2544_v55, %v2503_v58  ;;  %2676 = vst.msk [vmem:[%s4635_s29 + $0x20] sm:$0xff] %vm546_vm7, %v2549_v15  ;;  %v2579_v23 = vperm.slane %v2573_v20, %v3342_v30 }
 0x4b8   : > { %2672 = vst.msk [vmem:[%s4635_s29] sm:$0xff] %vm546_vm7, %v2545_v24  ;;  %v2620_v29 = vrot.slane %v2583_v44, 4  ;;  %v2623_v60 = vsel %vm378_vm6, %v2583_v44, %v2622_v48 }
 0x4b9   : > { %2680 = vst.msk [vmem:[%s4635_s29 + $0x40] sm:$0xff] %vm546_vm7, %v2553_v56  ;;  %v2608_v61 = vrot.slane %v2579_v23, 4  ;;  %v2446_v35 = vpop.permute.xlu1 %2445  ;;  %v2611_v34 = vsel %vm378_vm6, %v2579_v23, %v2610_v18  ;;  %v2631_v59 = vperm.slane %v2623_v60, %v3369_v51 }
 0x4ba   : > { %2684 = vst.msk [vmem:[%s4635_s29 + $0x60] sm:$0xff] %vm546_vm7, %v2557_v8  ;;  %v2621_v38 = vsel %vm378_vm6, %v2620_v29, %v2571_v41  ;;  %v2596_v19 = vrot.slane %v2446_v35, 4  ;;  %v2599_v2 = vsel %vm378_vm6, %v2446_v35, %v2598_v52  ;;  %v2443_v21 = vpop.permute.xlu0 %2442  ;;  %v2619_v22 = vperm.slane %v2611_v34, %v3369_v51 }
 0x4bb   : > { %v2609_v7 = vsel %vm378_vm6, %v2608_v61, %v2567_v14  ;;  %v2607_v11 = vperm.slane %v2599_v2, %v3342_v30  ;;  %v2584_v9 = vrot.slane %v2443_v21, 4  ;;  %v2627_v37 = vperm.slane %v2621_v38, %v3369_v51 }
 0x4bc   : > { %v2597_v58 = vsel %vm378_vm6, %v2596_v19, %v2440_v46  ;;  %v2587_v39 = vsel %vm378_vm6, %v2443_v21, %v2586_v53  ;;  %v2615_v0 = vperm.slane %v2609_v7, %v3369_v51  ;;  %v2662_v5 = vrot.slane %v2619_v22, 4 }
 0x4bd   : > { %v2603_v17 = vperm.slane %v2597_v58, %v3342_v30  ;;  %v2644_v28 = vrot.slane %v2607_v11, 4  ;;  %v2585_v49 = vsel %vm378_vm6, %v2584_v9, %v2437_v45  ;;  %v2595_v47 = vperm.slane %v2587_v39, %v3342_v30 }
 0x4be   : > { %v2591_v42 = vperm.slane %v2585_v49, %v3342_v30  ;;  %v2666_v43 = vrot.slane %v2627_v37, 4  ;;  %v2658_v57 = vrot.slane %v2615_v0, 4  ;;  %v2670_v26 = vrot.slane %v2631_v59, 4 }
 0x4bf   : > { %v2632_v40 = vrot.slane %v2603_v17, 4  ;;  %v2645_v1 = vsel %vm378_vm6, %v2644_v28, %v2595_v47  ;;  %v2646_v10 = vrot.slane %v2595_v47, 4 }
 0x4c0   : > { %v2634_v3 = vrot.slane %v2591_v42, 4  ;;  %v2651_v25 = vperm.slane %v2645_v1, %v3369_v51 }
 0x4c1   : > { %v2633_v32 = vsel %vm378_vm6, %v2632_v40, %v2591_v42  ;;  %v2647_v54 = vsel %vm378_vm6, %v2607_v11, %v2646_v10 }
 0x4c2   : > { %v2639_v30 = vperm.slane %v2633_v32, %v3369_v51  ;;  %v2635_v45 = vsel %vm378_vm6, %v2603_v17, %v2634_v3  ;;  %v2655_v13 = vperm.slane %v2647_v54, %v3369_v51  ;;  %v2664_v16 = vrot.slane %v2651_v25, 4 }
 0x4c3   : > { %v2667_v36 = vsel %vm378_vm6, %v2651_v25, %v2666_v43  ;;  %v2643_v4 = vperm.slane %v2635_v45, %v3369_v51 }
 0x4c4   : > { %v2656_v50 = vrot.slane %v2639_v30, 4  ;;  %v2659_v6 = vsel %vm378_vm6, %v2639_v30, %v2658_v57  ;;  %2683 = vst.msk [vmem:[%s4635_s29 + $0x58] sm:$0xff] %vm546_vm7, %v2667_v36  ;;  %v2665_v62 = vsel %vm378_vm6, %v2664_v16, %v2627_v37  ;;  %v2668_v33 = vrot.slane %v2655_v13, 4 }
 0x4c5   : > { %2675 = vst.msk [vmem:[%s4635_s29 + $0x18] sm:$0xff] %vm546_vm7, %v2659_v6  ;;  %v2660_v63 = vrot.slane %v2643_v4, 4  ;;  %v2663_v31 = vsel %vm378_vm6, %v2643_v4, %v2662_v5  ;;  %v2671_v55 = vsel %vm378_vm6, %v2655_v13, %v2670_v26 }
 0x4c6   : > { %v2657_v51 = vsel %vm378_vm6, %v2656_v50, %v2615_v0  ;;  %2681 = vst.msk [vmem:[%s4635_s29 + $0x48] sm:$0xff] %vm546_vm7, %v2665_v62  ;;  %v2669_v12 = vsel %vm378_vm6, %v2668_v33, %v2631_v59 }
 0x4c7   : > { %2673 = vst.msk [vmem:[%s4635_s29 + $0x8] sm:$0xff] %vm546_vm7, %v2657_v51  ;;  %v2661_v46 = vsel %vm378_vm6, %v2660_v63, %v2619_v22 }
 0x4c8   : > { %2679 = vst.msk [vmem:[%s4635_s29 + $0x38] sm:$0xff] %vm546_vm7, %v2663_v31 }
 0x4c9   : > { %2677 = vst.msk [vmem:[%s4635_s29 + $0x28] sm:$0xff] %vm546_vm7, %v2661_v46 }
 0x4ca   : > { %2685 = vst.msk [vmem:[%s4635_s29 + $0x68] sm:$0xff] %vm546_vm7, %v2669_v12 }
 0x4cb   : > { %2687 = vst.msk [vmem:[%s4635_s29 + $0x78] sm:$0xff] %vm546_vm7, %v2671_v55 }
 0x4cc   : > { %3045 = shalt.err (!%p3042_p13)
}
 0x4cd   : > { %s3118_s19 = smov 128   ;;  %s3119_s21 = smov 8  }
 0x4ce   : > { %2907 = dma.vmem_to_hbm [thread:$0]  (%p3191_p9), %s2706_s30, 2048, %s2708_s4, %s2689_s5, %s3118_s19, %s3118_s19, %s3119_s21  }
 0x4cf PF: > { %s2722_s23 = sand.u32 1, %s3080_s12   ;;  %p2914_p0 = pnand %p2843_p12, %p3198_p11 }
 0x4d0   : > { %s2723_s29 = scalar_lea.sflag [#allocation6], %s2722_s23 }
 0x4d1   : > { %p2915_p1 = pneg %p2914_p0 }
 0x4d3   : > { %3075 = dma.done.wait (%p2915_p1), %s2723_s29, 2048  }
 0x4d4   : > { %3077 = vsyncadd (%p2915_p1), %s2723_s29, 4294965248  ;;  %s19_s17 = sadd.s32 1, %s3100_s17   ;;  %s4763_s12 = smov %s3084_s13 }
 0x4d5   : > { %p16_p2 = scmp.ge.s32.totalorder %s19_s17, 4   ;;  %s4764_s13 = smov %s3088_s14 }
 0x4d6   : > { %s4765_s14 = smov %s3196_s26  ;;  %s4766_s15 = smov %s3096_s16 }
 0x4d7   : > { %s4767_s16 = smov %s4769_s20  ;;  %18 = sbr.rel (!%p16_p2) target bundleno = 6 (0x6), region = 90 }
 0x4dc   :  { %2729 = vsyncpa [#allocation5], 1 }
 0x4dd   :  { %2731 = vsyncpa [#allocation5 + $0x1], 1 }
 0x4de   :  { %2732 = vsyncpa [#allocation6], 1 }
 0x4df   :  { %2734 = vsyncpa [#allocation6 + $0x1], 1 }

</bundles_post_ra>
